<compile_context>
chip_gen: v7x
topology: tpu7x:2x2x1
jax: 0.10.0
libtpu: 0.0.40
codegen_flags: <defaults>
</compile_context>

<pallas_src>
import functools

import jax
import jax.numpy as jnp
import numpy as np
from jax.experimental import pallas as pl
from jax.experimental.pallas import tpu as pltpu

EPS = 1e-5


def _basic_block_kernel(x_ref, mask_ref, w1_ref, w2_ref,
                        g1_ref, b1_ref, g2_ref, b2_ref,
                        out_ref, xbuf_ref, ybuf_ref,
                        *, n, c, h, w):
    hp, wp = h + 2, w + 2
    l = hp * wp                # padded pixels per image
    nl = n * l                 # flat padded spatial length (lane axis)
    mg = wp + 1                # lane margin so every 3x3 tap is a pure slice
    inv_count = 1.0 / float(n * h * w)   # BN population = valid pixels only

    mask = mask_ref[...]       # (1, nl): 1.0 at valid (interior) pixels

    # Halo buffers must be exact zeros everywhere outside the valid interior.
    xbuf_ref[...] = jnp.zeros_like(xbuf_ref)
    ybuf_ref[...] = jnp.zeros_like(ybuf_ref)

    # Scatter the NCHW input row-by-row into the flat padded buffer.  This
    # folds the layout change (channels -> sublanes, flat spatial -> lanes)
    # and the zero padding into the kernel: no jnp.pad / transpose upstream.
    for ni in range(n):
        xn = x_ref[ni]                                      # (C, H, W)
        for i in range(h):
            dst = mg + ni * l + (i + 1) * wp + 1
            xbuf_ref[:, dst:dst + w] = xn[:, i, :]

    def conv3x3_bn(buf_ref, w_mat, gamma, beta):
        # im2col: 9 shifted lane-slices -> (9*Cin, NL) patch matrix, then a
        # single MXU matmul with K = 9*Cin.
        taps = []
        for kh in range(3):
            for kw in range(3):
                shift = (kh - 1) * wp + (kw - 1)
                taps.append(buf_ref[:, mg + shift:mg + shift + nl])  # (C, NL)
        patches = jnp.stack(taps, axis=0).reshape(9 * c, nl)         # (9C, NL)
        conv = jnp.dot(w_mat, patches,
                       preferred_element_type=jnp.float32)           # (C, NL)
        # Training-mode BatchNorm over valid pixels, one centered pass.
        mean = jnp.sum(conv * mask, axis=1, keepdims=True) * inv_count
        cd = (conv - mean) * mask
        var = jnp.sum(cd * cd, axis=1, keepdims=True) * inv_count
        y = cd * (jax.lax.rsqrt(var + EPS) * gamma) + beta
        return y, taps[4]      # taps[4] == unshifted input (residual identity)

    # conv1 -> bn1 -> relu
    y1, identity = conv3x3_bn(xbuf_ref, w1_ref[...], g1_ref[...], b1_ref[...])
    y1 = jnp.maximum(y1, 0.0)

    # Stage conv1's output for conv2; masking re-zeroes the halo pixels.
    ybuf_ref[:, mg:mg + nl] = y1 * mask

    # conv2 -> bn2 -> + identity -> relu
    y2, _ = conv3x3_bn(ybuf_ref, w2_ref[...], g2_ref[...], b2_ref[...])
    y2 = jnp.maximum(y2 + identity, 0.0)

    # Single lane-dense store; the wrapper crops the halo and restores NCHW.
    out_ref[...] = y2


def basic_block_forward(x_nchw, params):
    """BasicBlock.forward (stride=1, downsample=None) as one fused kernel."""
    n, c, h, w = x_nchw.shape
    cout = params["w1"].shape[0]
    assert cout == c, "stride=1 / downsample=None implies inplanes == planes"
    hp, wp = h + 2, w + 2
    l = hp * wp
    nl = n * l
    mg = wp + 1

    # Per-tap weight matrices: rows ordered (kh, kw, cin) to match the im2col
    # row order.  (In a real model these would be pre-transformed once.)
    w1_mat = jnp.transpose(params["w1"], (0, 2, 3, 1)).reshape(cout, 9 * c)
    w2_mat = jnp.transpose(params["w2"], (0, 2, 3, 1)).reshape(cout, 9 * c)

    # Static validity mask of the flat padded layout (interior pixels == 1).
    m_np = np.zeros((n, hp, wp), np.float32)
    m_np[:, 1:1 + h, 1:1 + w] = 1.0
    mask = jnp.asarray(m_np.reshape(1, nl))

    kern = functools.partial(_basic_block_kernel, n=n, c=c, h=h, w=w)

    def vmem():
        return pl.BlockSpec(memory_space=pltpu.MemorySpace.VMEM)

    flops = 2 * (2 * nl * (9 * c) * cout)          # two im2col matmuls
    bytes_accessed = 4 * (x_nchw.size + nl + 2 * (9 * c * cout)
                          + 4 * c + cout * nl)

    out_flat = pl.pallas_call(
        kern,
        out_shape=jax.ShapeDtypeStruct((cout, nl), jnp.float32),
        in_specs=[vmem() for _ in range(8)],
        out_specs=vmem(),
        scratch_shapes=[
            pltpu.VMEM((c, nl + 2 * mg), jnp.float32),      # padded input
            pltpu.VMEM((cout, nl + 2 * mg), jnp.float32),   # padded conv1 out
        ],
        compiler_params=pltpu.CompilerParams(
            vmem_limit_bytes=16 * 1024 * 1024),
        cost_estimate=pl.CostEstimate(
            flops=flops, transcendentals=2 * cout,
            bytes_accessed=bytes_accessed),
    )(x_nchw, mask, w1_mat, w2_mat,
      params["g1"].reshape(c, 1), params["b1"].reshape(c, 1),
      params["g2"].reshape(cout, 1), params["b2"].reshape(cout, 1))

    # Crop the 1-px halo and restore NCHW (tiny reshape/slice/transpose).
    out = out_flat.reshape(cout, n, hp, wp)[:, :, 1:1 + h, 1:1 + w]
    return jnp.transpose(out, (1, 0, 2, 3))


def reference_forward(x_nchw, params):
    """Pure-JAX reference (mirrors the PyTorch module in training mode)."""
    def conv(x, wgt):
        return jax.lax.conv_general_dilated(
            x, wgt, window_strides=(1, 1), padding="SAME",
            dimension_numbers=("NCHW", "OIHW", "NCHW"))

    def bn(x, g, b):
        mean = x.mean(axis=(0, 2, 3), keepdims=True)
        var = jnp.square(x - mean).mean(axis=(0, 2, 3), keepdims=True)
        xh = (x - mean) * jax.lax.rsqrt(var + EPS)
        return xh * g.reshape(1, -1, 1, 1) + b.reshape(1, -1, 1, 1)

    out = jax.nn.relu(bn(conv(x_nchw, params["w1"]), params["g1"], params["b1"]))
    out = bn(conv(out, params["w2"]), params["g2"], params["b2"]) + x_nchw
    return jax.nn.relu(out)


if __name__ == "__main__":
    # Small shapes: N=2, C=4 (inplanes == planes == 4), H=W=16, stride=1.
    N, C, H, W = 2, 4, 16, 16
    key = jax.random.PRNGKey(0)
    kx, kw1, kw2, kg1, kb1, kg2, kb2 = jax.random.split(key, 7)

    x = jax.random.normal(kx, (N, C, H, W), jnp.float32)
    params = {
        "w1": 0.3 * jax.random.normal(kw1, (C, C, 3, 3), jnp.float32),  # OIHW
        "w2": 0.3 * jax.random.normal(kw2, (C, C, 3, 3), jnp.float32),
        "g1": 1.0 + 0.1 * jax.random.normal(kg1, (C,), jnp.float32),
        "b1": 0.1 * jax.random.normal(kb1, (C,), jnp.float32),
        "g2": 1.0 + 0.1 * jax.random.normal(kg2, (C,), jnp.float32),
        "b2": 0.1 * jax.random.normal(kb2, (C,), jnp.float32),
    }

    out = jax.block_until_ready(basic_block_forward(x, params))
    ref = jax.block_until_ready(reference_forward(x, params))

    assert out.shape == (N, C, H, W), out.shape
    max_err = float(jnp.max(jnp.abs(out - ref)))
    assert max_err < 1e-4, f"mismatch vs reference: {max_err}"
    print("KERNEL_OK")
</pallas_src>

<mosaic_0001>
module attributes {stable_mosaic.version = 11 : i64} {
  func.func @_basic_block_kernel(%arg0: memref<2x4x16x16xf32, #tpu.memory_space<vmem>>, %arg1: memref<1x648xf32, #tpu.memory_space<vmem>>, %arg2: memref<4x36xf32, #tpu.memory_space<vmem>>, %arg3: memref<4x36xf32, #tpu.memory_space<vmem>>, %arg4: memref<4x1xf32, #tpu.memory_space<vmem>>, %arg5: memref<4x1xf32, #tpu.memory_space<vmem>>, %arg6: memref<4x1xf32, #tpu.memory_space<vmem>>, %arg7: memref<4x1xf32, #tpu.memory_space<vmem>>, %arg8: memref<4x648xf32, #tpu.memory_space<vmem>>, %arg9: memref<4x686xf32, #tpu.memory_space<vmem>>, %arg10: memref<4x686xf32, #tpu.memory_space<vmem>>) attributes {dimension_semantics = [], scalar_prefetch = 0 : i64, scratch_operands = 2 : i64, tpu.core_type = #tpu.core_type<tc>} {
    %c0 = arith.constant 0 : index
    %c0_0 = arith.constant 0 : index
    %0 = vector.load %arg1[%c0, %c0_0] : memref<1x648xf32, #tpu.memory_space<vmem>>, vector<1x648xf32>
    %cst = arith.constant 0.000000e+00 : f32
    %1 = vector.broadcast %cst : f32 to vector<4x686xf32>
    %c0_1 = arith.constant 0 : index
    %c0_2 = arith.constant 0 : index
    %2 = vector.load %arg9[%c0_1, %c0_2] : memref<4x686xf32, #tpu.memory_space<vmem>>, vector<4x686xf32>
    tpu.vector_store %arg9[%c0_1, %c0_2], %1 {strides = array<i32>} : memref<4x686xf32, #tpu.memory_space<vmem>>, vector<4x686xf32>,
    %cst_3 = arith.constant 0.000000e+00 : f32
    %3 = vector.broadcast %cst_3 : f32 to vector<4x686xf32>
    %c0_4 = arith.constant 0 : index
    %c0_5 = arith.constant 0 : index
    %4 = vector.load %arg10[%c0_4, %c0_5] : memref<4x686xf32, #tpu.memory_space<vmem>>, vector<4x686xf32>
    tpu.vector_store %arg10[%c0_4, %c0_5], %3 {strides = array<i32>} : memref<4x686xf32, #tpu.memory_space<vmem>>, vector<4x686xf32>,
    %c0_6 = arith.constant 0 : index
    %c0_7 = arith.constant 0 : index
    %c0_8 = arith.constant 0 : index
    %c0_9 = arith.constant 0 : index
    %5 = vector.load %arg0[%c0_6, %c0_7, %c0_8, %c0_9] : memref<2x4x16x16xf32, #tpu.memory_space<vmem>>, vector<1x4x16x16xf32>
    %6 = vector.shape_cast %5 : vector<1x4x16x16xf32> to vector<4x16x16xf32>
    %7 = vector.extract_strided_slice %6 {offsets = [0, 0, 0], sizes = [4, 1, 16], strides = [1, 1, 1]} : vector<4x16x16xf32> to vector<4x1x16xf32>
    %8 = vector.shape_cast %7 : vector<4x1x16xf32> to vector<4x16xf32>
    %c0_10 = arith.constant 0 : index
    %c38 = arith.constant 38 : index
    %9 = vector.load %arg9[%c0_10, %c38] : memref<4x686xf32, #tpu.memory_space<vmem>>, vector<4x16xf32>
    tpu.vector_store %arg9[%c0_10, %c38], %8 {strides = array<i32>} : memref<4x686xf32, #tpu.memory_space<vmem>>, vector<4x16xf32>,
    %10 = vector.extract_strided_slice %6 {offsets = [0, 1, 0], sizes = [4, 1, 16], strides = [1, 1, 1]} : vector<4x16x16xf32> to vector<4x1x16xf32>
    %11 = vector.shape_cast %10 : vector<4x1x16xf32> to vector<4x16xf32>
    %c0_11 = arith.constant 0 : index
    %c56 = arith.constant 56 : index
    %12 = vector.load %arg9[%c0_11, %c56] : memref<4x686xf32, #tpu.memory_space<vmem>>, vector<4x16xf32>
    tpu.vector_store %arg9[%c0_11, %c56], %11 {strides = array<i32>} : memref<4x686xf32, #tpu.memory_space<vmem>>, vector<4x16xf32>,
    %13 = vector.extract_strided_slice %6 {offsets = [0, 2, 0], sizes = [4, 1, 16], strides = [1, 1, 1]} : vector<4x16x16xf32> to vector<4x1x16xf32>
    %14 = vector.shape_cast %13 : vector<4x1x16xf32> to vector<4x16xf32>
    %c0_12 = arith.constant 0 : index
    %c74 = arith.constant 74 : index
    %15 = vector.load %arg9[%c0_12, %c74] : memref<4x686xf32, #tpu.memory_space<vmem>>, vector<4x16xf32>
    tpu.vector_store %arg9[%c0_12, %c74], %14 {strides = array<i32>} : memref<4x686xf32, #tpu.memory_space<vmem>>, vector<4x16xf32>,
    %16 = vector.extract_strided_slice %6 {offsets = [0, 3, 0], sizes = [4, 1, 16], strides = [1, 1, 1]} : vector<4x16x16xf32> to vector<4x1x16xf32>
    %17 = vector.shape_cast %16 : vector<4x1x16xf32> to vector<4x16xf32>
    %c0_13 = arith.constant 0 : index
    %c92 = arith.constant 92 : index
    %18 = vector.load %arg9[%c0_13, %c92] : memref<4x686xf32, #tpu.memory_space<vmem>>, vector<4x16xf32>
    tpu.vector_store %arg9[%c0_13, %c92], %17 {strides = array<i32>} : memref<4x686xf32, #tpu.memory_space<vmem>>, vector<4x16xf32>,
    %19 = vector.extract_strided_slice %6 {offsets = [0, 4, 0], sizes = [4, 1, 16], strides = [1, 1, 1]} : vector<4x16x16xf32> to vector<4x1x16xf32>
    %20 = vector.shape_cast %19 : vector<4x1x16xf32> to vector<4x16xf32>
    %c0_14 = arith.constant 0 : index
    %c110 = arith.constant 110 : index
    %21 = vector.load %arg9[%c0_14, %c110] : memref<4x686xf32, #tpu.memory_space<vmem>>, vector<4x16xf32>
    tpu.vector_store %arg9[%c0_14, %c110], %20 {strides = array<i32>} : memref<4x686xf32, #tpu.memory_space<vmem>>, vector<4x16xf32>,
    %22 = vector.extract_strided_slice %6 {offsets = [0, 5, 0], sizes = [4, 1, 16], strides = [1, 1, 1]} : vector<4x16x16xf32> to vector<4x1x16xf32>
    %23 = vector.shape_cast %22 : vector<4x1x16xf32> to vector<4x16xf32>
    %c0_15 = arith.constant 0 : index
    %c128 = arith.constant 128 : index
    %24 = vector.load %arg9[%c0_15, %c128] : memref<4x686xf32, #tpu.memory_space<vmem>>, vector<4x16xf32>
    tpu.vector_store %arg9[%c0_15, %c128], %23 {strides = array<i32>} : memref<4x686xf32, #tpu.memory_space<vmem>>, vector<4x16xf32>,
    %25 = vector.extract_strided_slice %6 {offsets = [0, 6, 0], sizes = [4, 1, 16], strides = [1, 1, 1]} : vector<4x16x16xf32> to vector<4x1x16xf32>
    %26 = vector.shape_cast %25 : vector<4x1x16xf32> to vector<4x16xf32>
    %c0_16 = arith.constant 0 : index
    %c146 = arith.constant 146 : index
    %27 = vector.load %arg9[%c0_16, %c146] : memref<4x686xf32, #tpu.memory_space<vmem>>, vector<4x16xf32>
    tpu.vector_store %arg9[%c0_16, %c146], %26 {strides = array<i32>} : memref<4x686xf32, #tpu.memory_space<vmem>>, vector<4x16xf32>,
    %28 = vector.extract_strided_slice %6 {offsets = [0, 7, 0], sizes = [4, 1, 16], strides = [1, 1, 1]} : vector<4x16x16xf32> to vector<4x1x16xf32>
    %29 = vector.shape_cast %28 : vector<4x1x16xf32> to vector<4x16xf32>
    %c0_17 = arith.constant 0 : index
    %c164 = arith.constant 164 : index
    %30 = vector.load %arg9[%c0_17, %c164] : memref<4x686xf32, #tpu.memory_space<vmem>>, vector<4x16xf32>
    tpu.vector_store %arg9[%c0_17, %c164], %29 {strides = array<i32>} : memref<4x686xf32, #tpu.memory_space<vmem>>, vector<4x16xf32>,
    %31 = vector.extract_strided_slice %6 {offsets = [0, 8, 0], sizes = [4, 1, 16], strides = [1, 1, 1]} : vector<4x16x16xf32> to vector<4x1x16xf32>
    %32 = vector.shape_cast %31 : vector<4x1x16xf32> to vector<4x16xf32>
    %c0_18 = arith.constant 0 : index
    %c182 = arith.constant 182 : index
    %33 = vector.load %arg9[%c0_18, %c182] : memref<4x686xf32, #tpu.memory_space<vmem>>, vector<4x16xf32>
    tpu.vector_store %arg9[%c0_18, %c182], %32 {strides = array<i32>} : memref<4x686xf32, #tpu.memory_space<vmem>>, vector<4x16xf32>,
    %34 = vector.extract_strided_slice %6 {offsets = [0, 9, 0], sizes = [4, 1, 16], strides = [1, 1, 1]} : vector<4x16x16xf32> to vector<4x1x16xf32>
    %35 = vector.shape_cast %34 : vector<4x1x16xf32> to vector<4x16xf32>
    %c0_19 = arith.constant 0 : index
    %c200 = arith.constant 200 : index
    %36 = vector.load %arg9[%c0_19, %c200] : memref<4x686xf32, #tpu.memory_space<vmem>>, vector<4x16xf32>
    tpu.vector_store %arg9[%c0_19, %c200], %35 {strides = array<i32>} : memref<4x686xf32, #tpu.memory_space<vmem>>, vector<4x16xf32>,
    %37 = vector.extract_strided_slice %6 {offsets = [0, 10, 0], sizes = [4, 1, 16], strides = [1, 1, 1]} : vector<4x16x16xf32> to vector<4x1x16xf32>
    %38 = vector.shape_cast %37 : vector<4x1x16xf32> to vector<4x16xf32>
    %c0_20 = arith.constant 0 : index
    %c218 = arith.constant 218 : index
    %39 = vector.load %arg9[%c0_20, %c218] : memref<4x686xf32, #tpu.memory_space<vmem>>, vector<4x16xf32>
    tpu.vector_store %arg9[%c0_20, %c218], %38 {strides = array<i32>} : memref<4x686xf32, #tpu.memory_space<vmem>>, vector<4x16xf32>,
    %40 = vector.extract_strided_slice %6 {offsets = [0, 11, 0], sizes = [4, 1, 16], strides = [1, 1, 1]} : vector<4x16x16xf32> to vector<4x1x16xf32>
    %41 = vector.shape_cast %40 : vector<4x1x16xf32> to vector<4x16xf32>
    %c0_21 = arith.constant 0 : index
    %c236 = arith.constant 236 : index
    %42 = vector.load %arg9[%c0_21, %c236] : memref<4x686xf32, #tpu.memory_space<vmem>>, vector<4x16xf32>
    tpu.vector_store %arg9[%c0_21, %c236], %41 {strides = array<i32>} : memref<4x686xf32, #tpu.memory_space<vmem>>, vector<4x16xf32>,
    %43 = vector.extract_strided_slice %6 {offsets = [0, 12, 0], sizes = [4, 1, 16], strides = [1, 1, 1]} : vector<4x16x16xf32> to vector<4x1x16xf32>
    %44 = vector.shape_cast %43 : vector<4x1x16xf32> to vector<4x16xf32>
    %c0_22 = arith.constant 0 : index
    %c254 = arith.constant 254 : index
    %45 = vector.load %arg9[%c0_22, %c254] : memref<4x686xf32, #tpu.memory_space<vmem>>, vector<4x16xf32>
    tpu.vector_store %arg9[%c0_22, %c254], %44 {strides = array<i32>} : memref<4x686xf32, #tpu.memory_space<vmem>>, vector<4x16xf32>,
    %46 = vector.extract_strided_slice %6 {offsets = [0, 13, 0], sizes = [4, 1, 16], strides = [1, 1, 1]} : vector<4x16x16xf32> to vector<4x1x16xf32>
    %47 = vector.shape_cast %46 : vector<4x1x16xf32> to vector<4x16xf32>
    %c0_23 = arith.constant 0 : index
    %c272 = arith.constant 272 : index
    %48 = vector.load %arg9[%c0_23, %c272] : memref<4x686xf32, #tpu.memory_space<vmem>>, vector<4x16xf32>
    tpu.vector_store %arg9[%c0_23, %c272], %47 {strides = array<i32>} : memref<4x686xf32, #tpu.memory_space<vmem>>, vector<4x16xf32>,
    %49 = vector.extract_strided_slice %6 {offsets = [0, 14, 0], sizes = [4, 1, 16], strides = [1, 1, 1]} : vector<4x16x16xf32> to vector<4x1x16xf32>
    %50 = vector.shape_cast %49 : vector<4x1x16xf32> to vector<4x16xf32>
    %c0_24 = arith.constant 0 : index
    %c290 = arith.constant 290 : index
    %51 = vector.load %arg9[%c0_24, %c290] : memref<4x686xf32, #tpu.memory_space<vmem>>, vector<4x16xf32>
    tpu.vector_store %arg9[%c0_24, %c290], %50 {strides = array<i32>} : memref<4x686xf32, #tpu.memory_space<vmem>>, vector<4x16xf32>,
    %52 = vector.extract_strided_slice %6 {offsets = [0, 15, 0], sizes = [4, 1, 16], strides = [1, 1, 1]} : vector<4x16x16xf32> to vector<4x1x16xf32>
    %53 = vector.shape_cast %52 : vector<4x1x16xf32> to vector<4x16xf32>
    %c0_25 = arith.constant 0 : index
    %c308 = arith.constant 308 : index
    %54 = vector.load %arg9[%c0_25, %c308] : memref<4x686xf32, #tpu.memory_space<vmem>>, vector<4x16xf32>
    tpu.vector_store %arg9[%c0_25, %c308], %53 {strides = array<i32>} : memref<4x686xf32, #tpu.memory_space<vmem>>, vector<4x16xf32>,
    %c1 = arith.constant 1 : index
    %c0_26 = arith.constant 0 : index
    %c0_27 = arith.constant 0 : index
    %c0_28 = arith.constant 0 : index
    %55 = vector.load %arg0[%c1, %c0_26, %c0_27, %c0_28] : memref<2x4x16x16xf32, #tpu.memory_space<vmem>>, vector<1x4x16x16xf32>
    %56 = vector.shape_cast %55 : vector<1x4x16x16xf32> to vector<4x16x16xf32>
    %57 = vector.extract_strided_slice %56 {offsets = [0, 0, 0], sizes = [4, 1, 16], strides = [1, 1, 1]} : vector<4x16x16xf32> to vector<4x1x16xf32>
    %58 = vector.shape_cast %57 : vector<4x1x16xf32> to vector<4x16xf32>
    %c0_29 = arith.constant 0 : index
    %c362 = arith.constant 362 : index
    %59 = vector.load %arg9[%c0_29, %c362] : memref<4x686xf32, #tpu.memory_space<vmem>>, vector<4x16xf32>
    tpu.vector_store %arg9[%c0_29, %c362], %58 {strides = array<i32>} : memref<4x686xf32, #tpu.memory_space<vmem>>, vector<4x16xf32>,
    %60 = vector.extract_strided_slice %56 {offsets = [0, 1, 0], sizes = [4, 1, 16], strides = [1, 1, 1]} : vector<4x16x16xf32> to vector<4x1x16xf32>
    %61 = vector.shape_cast %60 : vector<4x1x16xf32> to vector<4x16xf32>
    %c0_30 = arith.constant 0 : index
    %c380 = arith.constant 380 : index
    %62 = vector.load %arg9[%c0_30, %c380] : memref<4x686xf32, #tpu.memory_space<vmem>>, vector<4x16xf32>
    tpu.vector_store %arg9[%c0_30, %c380], %61 {strides = array<i32>} : memref<4x686xf32, #tpu.memory_space<vmem>>, vector<4x16xf32>,
    %63 = vector.extract_strided_slice %56 {offsets = [0, 2, 0], sizes = [4, 1, 16], strides = [1, 1, 1]} : vector<4x16x16xf32> to vector<4x1x16xf32>
    %64 = vector.shape_cast %63 : vector<4x1x16xf32> to vector<4x16xf32>
    %c0_31 = arith.constant 0 : index
    %c398 = arith.constant 398 : index
    %65 = vector.load %arg9[%c0_31, %c398] : memref<4x686xf32, #tpu.memory_space<vmem>>, vector<4x16xf32>
    tpu.vector_store %arg9[%c0_31, %c398], %64 {strides = array<i32>} : memref<4x686xf32, #tpu.memory_space<vmem>>, vector<4x16xf32>,
    %66 = vector.extract_strided_slice %56 {offsets = [0, 3, 0], sizes = [4, 1, 16], strides = [1, 1, 1]} : vector<4x16x16xf32> to vector<4x1x16xf32>
    %67 = vector.shape_cast %66 : vector<4x1x16xf32> to vector<4x16xf32>
    %c0_32 = arith.constant 0 : index
    %c416 = arith.constant 416 : index
    %68 = vector.load %arg9[%c0_32, %c416] : memref<4x686xf32, #tpu.memory_space<vmem>>, vector<4x16xf32>
    tpu.vector_store %arg9[%c0_32, %c416], %67 {strides = array<i32>} : memref<4x686xf32, #tpu.memory_space<vmem>>, vector<4x16xf32>,
    %69 = vector.extract_strided_slice %56 {offsets = [0, 4, 0], sizes = [4, 1, 16], strides = [1, 1, 1]} : vector<4x16x16xf32> to vector<4x1x16xf32>
    %70 = vector.shape_cast %69 : vector<4x1x16xf32> to vector<4x16xf32>
    %c0_33 = arith.constant 0 : index
    %c434 = arith.constant 434 : index
    %71 = vector.load %arg9[%c0_33, %c434] : memref<4x686xf32, #tpu.memory_space<vmem>>, vector<4x16xf32>
    tpu.vector_store %arg9[%c0_33, %c434], %70 {strides = array<i32>} : memref<4x686xf32, #tpu.memory_space<vmem>>, vector<4x16xf32>,
    %72 = vector.extract_strided_slice %56 {offsets = [0, 5, 0], sizes = [4, 1, 16], strides = [1, 1, 1]} : vector<4x16x16xf32> to vector<4x1x16xf32>
    %73 = vector.shape_cast %72 : vector<4x1x16xf32> to vector<4x16xf32>
    %c0_34 = arith.constant 0 : index
    %c452 = arith.constant 452 : index
    %74 = vector.load %arg9[%c0_34, %c452] : memref<4x686xf32, #tpu.memory_space<vmem>>, vector<4x16xf32>
    tpu.vector_store %arg9[%c0_34, %c452], %73 {strides = array<i32>} : memref<4x686xf32, #tpu.memory_space<vmem>>, vector<4x16xf32>,
    %75 = vector.extract_strided_slice %56 {offsets = [0, 6, 0], sizes = [4, 1, 16], strides = [1, 1, 1]} : vector<4x16x16xf32> to vector<4x1x16xf32>
    %76 = vector.shape_cast %75 : vector<4x1x16xf32> to vector<4x16xf32>
    %c0_35 = arith.constant 0 : index
    %c470 = arith.constant 470 : index
    %77 = vector.load %arg9[%c0_35, %c470] : memref<4x686xf32, #tpu.memory_space<vmem>>, vector<4x16xf32>
    tpu.vector_store %arg9[%c0_35, %c470], %76 {strides = array<i32>} : memref<4x686xf32, #tpu.memory_space<vmem>>, vector<4x16xf32>,
    %78 = vector.extract_strided_slice %56 {offsets = [0, 7, 0], sizes = [4, 1, 16], strides = [1, 1, 1]} : vector<4x16x16xf32> to vector<4x1x16xf32>
    %79 = vector.shape_cast %78 : vector<4x1x16xf32> to vector<4x16xf32>
    %c0_36 = arith.constant 0 : index
    %c488 = arith.constant 488 : index
    %80 = vector.load %arg9[%c0_36, %c488] : memref<4x686xf32, #tpu.memory_space<vmem>>, vector<4x16xf32>
    tpu.vector_store %arg9[%c0_36, %c488], %79 {strides = array<i32>} : memref<4x686xf32, #tpu.memory_space<vmem>>, vector<4x16xf32>,
    %81 = vector.extract_strided_slice %56 {offsets = [0, 8, 0], sizes = [4, 1, 16], strides = [1, 1, 1]} : vector<4x16x16xf32> to vector<4x1x16xf32>
    %82 = vector.shape_cast %81 : vector<4x1x16xf32> to vector<4x16xf32>
    %c0_37 = arith.constant 0 : index
    %c506 = arith.constant 506 : index
    %83 = vector.load %arg9[%c0_37, %c506] : memref<4x686xf32, #tpu.memory_space<vmem>>, vector<4x16xf32>
    tpu.vector_store %arg9[%c0_37, %c506], %82 {strides = array<i32>} : memref<4x686xf32, #tpu.memory_space<vmem>>, vector<4x16xf32>,
    %84 = vector.extract_strided_slice %56 {offsets = [0, 9, 0], sizes = [4, 1, 16], strides = [1, 1, 1]} : vector<4x16x16xf32> to vector<4x1x16xf32>
    %85 = vector.shape_cast %84 : vector<4x1x16xf32> to vector<4x16xf32>
    %c0_38 = arith.constant 0 : index
    %c524 = arith.constant 524 : index
    %86 = vector.load %arg9[%c0_38, %c524] : memref<4x686xf32, #tpu.memory_space<vmem>>, vector<4x16xf32>
    tpu.vector_store %arg9[%c0_38, %c524], %85 {strides = array<i32>} : memref<4x686xf32, #tpu.memory_space<vmem>>, vector<4x16xf32>,
    %87 = vector.extract_strided_slice %56 {offsets = [0, 10, 0], sizes = [4, 1, 16], strides = [1, 1, 1]} : vector<4x16x16xf32> to vector<4x1x16xf32>
    %88 = vector.shape_cast %87 : vector<4x1x16xf32> to vector<4x16xf32>
    %c0_39 = arith.constant 0 : index
    %c542 = arith.constant 542 : index
    %89 = vector.load %arg9[%c0_39, %c542] : memref<4x686xf32, #tpu.memory_space<vmem>>, vector<4x16xf32>
    tpu.vector_store %arg9[%c0_39, %c542], %88 {strides = array<i32>} : memref<4x686xf32, #tpu.memory_space<vmem>>, vector<4x16xf32>,
    %90 = vector.extract_strided_slice %56 {offsets = [0, 11, 0], sizes = [4, 1, 16], strides = [1, 1, 1]} : vector<4x16x16xf32> to vector<4x1x16xf32>
    %91 = vector.shape_cast %90 : vector<4x1x16xf32> to vector<4x16xf32>
    %c0_40 = arith.constant 0 : index
    %c560 = arith.constant 560 : index
    %92 = vector.load %arg9[%c0_40, %c560] : memref<4x686xf32, #tpu.memory_space<vmem>>, vector<4x16xf32>
    tpu.vector_store %arg9[%c0_40, %c560], %91 {strides = array<i32>} : memref<4x686xf32, #tpu.memory_space<vmem>>, vector<4x16xf32>,
    %93 = vector.extract_strided_slice %56 {offsets = [0, 12, 0], sizes = [4, 1, 16], strides = [1, 1, 1]} : vector<4x16x16xf32> to vector<4x1x16xf32>
    %94 = vector.shape_cast %93 : vector<4x1x16xf32> to vector<4x16xf32>
    %c0_41 = arith.constant 0 : index
    %c578 = arith.constant 578 : index
    %95 = vector.load %arg9[%c0_41, %c578] : memref<4x686xf32, #tpu.memory_space<vmem>>, vector<4x16xf32>
    tpu.vector_store %arg9[%c0_41, %c578], %94 {strides = array<i32>} : memref<4x686xf32, #tpu.memory_space<vmem>>, vector<4x16xf32>,
    %96 = vector.extract_strided_slice %56 {offsets = [0, 13, 0], sizes = [4, 1, 16], strides = [1, 1, 1]} : vector<4x16x16xf32> to vector<4x1x16xf32>
    %97 = vector.shape_cast %96 : vector<4x1x16xf32> to vector<4x16xf32>
    %c0_42 = arith.constant 0 : index
    %c596 = arith.constant 596 : index
    %98 = vector.load %arg9[%c0_42, %c596] : memref<4x686xf32, #tpu.memory_space<vmem>>, vector<4x16xf32>
    tpu.vector_store %arg9[%c0_42, %c596], %97 {strides = array<i32>} : memref<4x686xf32, #tpu.memory_space<vmem>>, vector<4x16xf32>,
    %99 = vector.extract_strided_slice %56 {offsets = [0, 14, 0], sizes = [4, 1, 16], strides = [1, 1, 1]} : vector<4x16x16xf32> to vector<4x1x16xf32>
    %100 = vector.shape_cast %99 : vector<4x1x16xf32> to vector<4x16xf32>
    %c0_43 = arith.constant 0 : index
    %c614 = arith.constant 614 : index
    %101 = vector.load %arg9[%c0_43, %c614] : memref<4x686xf32, #tpu.memory_space<vmem>>, vector<4x16xf32>
    tpu.vector_store %arg9[%c0_43, %c614], %100 {strides = array<i32>} : memref<4x686xf32, #tpu.memory_space<vmem>>, vector<4x16xf32>,
    %102 = vector.extract_strided_slice %56 {offsets = [0, 15, 0], sizes = [4, 1, 16], strides = [1, 1, 1]} : vector<4x16x16xf32> to vector<4x1x16xf32>
    %103 = vector.shape_cast %102 : vector<4x1x16xf32> to vector<4x16xf32>
    %c0_44 = arith.constant 0 : index
    %c632 = arith.constant 632 : index
    %104 = vector.load %arg9[%c0_44, %c632] : memref<4x686xf32, #tpu.memory_space<vmem>>, vector<4x16xf32>
    tpu.vector_store %arg9[%c0_44, %c632], %103 {strides = array<i32>} : memref<4x686xf32, #tpu.memory_space<vmem>>, vector<4x16xf32>,
    %c0_45 = arith.constant 0 : index
    %c0_46 = arith.constant 0 : index
    %105 = vector.load %arg2[%c0_45, %c0_46] : memref<4x36xf32, #tpu.memory_space<vmem>>, vector<4x36xf32>
    %c0_47 = arith.constant 0 : index
    %c0_48 = arith.constant 0 : index
    %106 = vector.load %arg4[%c0_47, %c0_48] : memref<4x1xf32, #tpu.memory_space<vmem>>, vector<4x1xf32>
    %c0_49 = arith.constant 0 : index
    %c0_50 = arith.constant 0 : index
    %107 = vector.load %arg5[%c0_49, %c0_50] : memref<4x1xf32, #tpu.memory_space<vmem>>, vector<4x1xf32>
    %c0_51 = arith.constant 0 : index
    %c0_52 = arith.constant 0 : index
    %108 = vector.load %arg9[%c0_51, %c0_52] : memref<4x686xf32, #tpu.memory_space<vmem>>, vector<4x648xf32>
    %c0_53 = arith.constant 0 : index
    %c1_54 = arith.constant 1 : index
    %109 = vector.load %arg9[%c0_53, %c1_54] : memref<4x686xf32, #tpu.memory_space<vmem>>, vector<4x648xf32>
    %c0_55 = arith.constant 0 : index
    %c2 = arith.constant 2 : index
    %110 = vector.load %arg9[%c0_55, %c2] : memref<4x686xf32, #tpu.memory_space<vmem>>, vector<4x648xf32>
    %c0_56 = arith.constant 0 : index
    %c18 = arith.constant 18 : index
    %111 = vector.load %arg9[%c0_56, %c18] : memref<4x686xf32, #tpu.memory_space<vmem>>, vector<4x648xf32>
    %c0_57 = arith.constant 0 : index
    %c19 = arith.constant 19 : index
    %112 = vector.load %arg9[%c0_57, %c19] : memref<4x686xf32, #tpu.memory_space<vmem>>, vector<4x648xf32>
    %c0_58 = arith.constant 0 : index
    %c20 = arith.constant 20 : index
    %113 = vector.load %arg9[%c0_58, %c20] : memref<4x686xf32, #tpu.memory_space<vmem>>, vector<4x648xf32>
    %c0_59 = arith.constant 0 : index
    %c36 = arith.constant 36 : index
    %114 = vector.load %arg9[%c0_59, %c36] : memref<4x686xf32, #tpu.memory_space<vmem>>, vector<4x648xf32>
    %c0_60 = arith.constant 0 : index
    %c37 = arith.constant 37 : index
    %115 = vector.load %arg9[%c0_60, %c37] : memref<4x686xf32, #tpu.memory_space<vmem>>, vector<4x648xf32>
    %c0_61 = arith.constant 0 : index
    %c38_62 = arith.constant 38 : index
    %116 = vector.load %arg9[%c0_61, %c38_62] : memref<4x686xf32, #tpu.memory_space<vmem>>, vector<4x648xf32>
    %117 = vector.shape_cast %108 : vector<4x648xf32> to vector<1x4x648xf32>
    %118 = vector.shape_cast %109 : vector<4x648xf32> to vector<1x4x648xf32>
    %119 = vector.shape_cast %110 : vector<4x648xf32> to vector<1x4x648xf32>
    %120 = vector.shape_cast %111 : vector<4x648xf32> to vector<1x4x648xf32>
    %121 = vector.shape_cast %112 : vector<4x648xf32> to vector<1x4x648xf32>
    %122 = vector.shape_cast %113 : vector<4x648xf32> to vector<1x4x648xf32>
    %123 = vector.shape_cast %114 : vector<4x648xf32> to vector<1x4x648xf32>
    %124 = vector.shape_cast %115 : vector<4x648xf32> to vector<1x4x648xf32>
    %125 = vector.shape_cast %116 : vector<4x648xf32> to vector<1x4x648xf32>
    %126 = tpu.concatenate %117, %118, %119, %120, %121, %122, %123, %124, %125 in 0 : vector<1x4x648xf32>, vector<1x4x648xf32>, vector<1x4x648xf32>, vector<1x4x648xf32>, vector<1x4x648xf32>, vector<1x4x648xf32>, vector<1x4x648xf32>, vector<1x4x648xf32>, vector<1x4x648xf32> -> vector<9x4x648xf32>
    %127 = vector.shape_cast %126 : vector<9x4x648xf32> to vector<36x648xf32>
    %cst_63 = arith.constant dense<0.000000e+00> : vector<4x648xf32>
    %128 = tpu.matmul %105, %127, %cst_63 {dimension_numbers = #tpu.dot_dimension_numbers<[1], [0], [0], [1], [0, 0, 1, 1], [], []>} : vector<4x36xf32>, vector<36x648xf32>, vector<4x648xf32> -> vector<4x648xf32>
    %129 = vector.broadcast %0 : vector<1x648xf32> to vector<4x648xf32>
    %130 = arith.mulf %128, %129 : vector<4x648xf32>
    %cst_64 = arith.constant dense<0.000000e+00> : vector<4xf32>
    %131 = vector.multi_reduction <add>, %130, %cst_64 [1] : vector<4x648xf32> to vector<4xf32>
    %132 = vector.shape_cast %131 : vector<4xf32> to vector<4x1xf32>
    %cst_65 = arith.constant 0.001953125 : f32
    %133 = vector.broadcast %cst_65 : f32 to vector<4x1xf32>
    %134 = arith.mulf %132, %133 : vector<4x1xf32>
    %135 = vector.broadcast %134 : vector<4x1xf32> to vector<4x648xf32>
    %136 = arith.subf %128, %135 : vector<4x648xf32>
    %137 = vector.broadcast %0 : vector<1x648xf32> to vector<4x648xf32>
    %138 = arith.mulf %136, %137 : vector<4x648xf32>
    %139 = arith.mulf %138, %138 : vector<4x648xf32>
    %cst_66 = arith.constant dense<0.000000e+00> : vector<4xf32>
    %140 = vector.multi_reduction <add>, %139, %cst_66 [1] : vector<4x648xf32> to vector<4xf32>
    %141 = vector.shape_cast %140 : vector<4xf32> to vector<4x1xf32>
    %cst_67 = arith.constant 0.001953125 : f32
    %142 = vector.broadcast %cst_67 : f32 to vector<4x1xf32>
    %143 = arith.mulf %141, %142 : vector<4x1xf32>
    %cst_68 = arith.constant 9.99999974E-6 : f32
    %144 = vector.broadcast %cst_68 : f32 to vector<4x1xf32>
    %145 = arith.addf %143, %144 : vector<4x1xf32>
    %146 = math.rsqrt %145 : vector<4x1xf32>
    %147 = arith.mulf %146, %106 : vector<4x1xf32>
    %148 = vector.broadcast %147 : vector<4x1xf32> to vector<4x648xf32>
    %149 = arith.mulf %138, %148 : vector<4x648xf32>
    %150 = vector.broadcast %107 : vector<4x1xf32> to vector<4x648xf32>
    %151 = arith.addf %149, %150 : vector<4x648xf32>
    %cst_69 = arith.constant 0.000000e+00 : f32
    %152 = vector.broadcast %cst_69 : f32 to vector<4x648xf32>
    %153 = arith.maximumf %151, %152 : vector<4x648xf32>
    %154 = vector.broadcast %0 : vector<1x648xf32> to vector<4x648xf32>
    %155 = arith.mulf %153, %154 : vector<4x648xf32>
    %c0_70 = arith.constant 0 : index
    %c19_71 = arith.constant 19 : index
    %156 = vector.load %arg10[%c0_70, %c19_71] : memref<4x686xf32, #tpu.memory_space<vmem>>, vector<4x648xf32>
    tpu.vector_store %arg10[%c0_70, %c19_71], %155 {strides = array<i32>} : memref<4x686xf32, #tpu.memory_space<vmem>>, vector<4x648xf32>,
    %c0_72 = arith.constant 0 : index
    %c0_73 = arith.constant 0 : index
    %157 = vector.load %arg3[%c0_72, %c0_73] : memref<4x36xf32, #tpu.memory_space<vmem>>, vector<4x36xf32>
    %c0_74 = arith.constant 0 : index
    %c0_75 = arith.constant 0 : index
    %158 = vector.load %arg6[%c0_74, %c0_75] : memref<4x1xf32, #tpu.memory_space<vmem>>, vector<4x1xf32>
    %c0_76 = arith.constant 0 : index
    %c0_77 = arith.constant 0 : index
    %159 = vector.load %arg7[%c0_76, %c0_77] : memref<4x1xf32, #tpu.memory_space<vmem>>, vector<4x1xf32>
    %c0_78 = arith.constant 0 : index
    %c0_79 = arith.constant 0 : index
    %160 = vector.load %arg10[%c0_78, %c0_79] : memref<4x686xf32, #tpu.memory_space<vmem>>, vector<4x648xf32>
    %c0_80 = arith.constant 0 : index
    %c1_81 = arith.constant 1 : index
    %161 = vector.load %arg10[%c0_80, %c1_81] : memref<4x686xf32, #tpu.memory_space<vmem>>, vector<4x648xf32>
    %c0_82 = arith.constant 0 : index
    %c2_83 = arith.constant 2 : index
    %162 = vector.load %arg10[%c0_82, %c2_83] : memref<4x686xf32, #tpu.memory_space<vmem>>, vector<4x648xf32>
    %c0_84 = arith.constant 0 : index
    %c18_85 = arith.constant 18 : index
    %163 = vector.load %arg10[%c0_84, %c18_85] : memref<4x686xf32, #tpu.memory_space<vmem>>, vector<4x648xf32>
    %c0_86 = arith.constant 0 : index
    %c19_87 = arith.constant 19 : index
    %164 = vector.load %arg10[%c0_86, %c19_87] : memref<4x686xf32, #tpu.memory_space<vmem>>, vector<4x648xf32>
    %c0_88 = arith.constant 0 : index
    %c20_89 = arith.constant 20 : index
    %165 = vector.load %arg10[%c0_88, %c20_89] : memref<4x686xf32, #tpu.memory_space<vmem>>, vector<4x648xf32>
    %c0_90 = arith.constant 0 : index
    %c36_91 = arith.constant 36 : index
    %166 = vector.load %arg10[%c0_90, %c36_91] : memref<4x686xf32, #tpu.memory_space<vmem>>, vector<4x648xf32>
    %c0_92 = arith.constant 0 : index
    %c37_93 = arith.constant 37 : index
    %167 = vector.load %arg10[%c0_92, %c37_93] : memref<4x686xf32, #tpu.memory_space<vmem>>, vector<4x648xf32>
    %c0_94 = arith.constant 0 : index
    %c38_95 = arith.constant 38 : index
    %168 = vector.load %arg10[%c0_94, %c38_95] : memref<4x686xf32, #tpu.memory_space<vmem>>, vector<4x648xf32>
    %169 = vector.shape_cast %160 : vector<4x648xf32> to vector<1x4x648xf32>
    %170 = vector.shape_cast %161 : vector<4x648xf32> to vector<1x4x648xf32>
    %171 = vector.shape_cast %162 : vector<4x648xf32> to vector<1x4x648xf32>
    %172 = vector.shape_cast %163 : vector<4x648xf32> to vector<1x4x648xf32>
    %173 = vector.shape_cast %164 : vector<4x648xf32> to vector<1x4x648xf32>
    %174 = vector.shape_cast %165 : vector<4x648xf32> to vector<1x4x648xf32>
    %175 = vector.shape_cast %166 : vector<4x648xf32> to vector<1x4x648xf32>
    %176 = vector.shape_cast %167 : vector<4x648xf32> to vector<1x4x648xf32>
    %177 = vector.shape_cast %168 : vector<4x648xf32> to vector<1x4x648xf32>
    %178 = tpu.concatenate %169, %170, %171, %172, %173, %174, %175, %176, %177 in 0 : vector<1x4x648xf32>, vector<1x4x648xf32>, vector<1x4x648xf32>, vector<1x4x648xf32>, vector<1x4x648xf32>, vector<1x4x648xf32>, vector<1x4x648xf32>, vector<1x4x648xf32>, vector<1x4x648xf32> -> vector<9x4x648xf32>
    %179 = vector.shape_cast %178 : vector<9x4x648xf32> to vector<36x648xf32>
    %cst_96 = arith.constant dense<0.000000e+00> : vector<4x648xf32>
    %180 = tpu.matmul %157, %179, %cst_96 {dimension_numbers = #tpu.dot_dimension_numbers<[1], [0], [0], [1], [0, 0, 1, 1], [], []>} : vector<4x36xf32>, vector<36x648xf32>, vector<4x648xf32> -> vector<4x648xf32>
    %181 = vector.broadcast %0 : vector<1x648xf32> to vector<4x648xf32>
    %182 = arith.mulf %180, %181 : vector<4x648xf32>
    %cst_97 = arith.constant dense<0.000000e+00> : vector<4xf32>
    %183 = vector.multi_reduction <add>, %182, %cst_97 [1] : vector<4x648xf32> to vector<4xf32>
    %184 = vector.shape_cast %183 : vector<4xf32> to vector<4x1xf32>
    %cst_98 = arith.constant 0.001953125 : f32
    %185 = vector.broadcast %cst_98 : f32 to vector<4x1xf32>
    %186 = arith.mulf %184, %185 : vector<4x1xf32>
    %187 = vector.broadcast %186 : vector<4x1xf32> to vector<4x648xf32>
    %188 = arith.subf %180, %187 : vector<4x648xf32>
    %189 = vector.broadcast %0 : vector<1x648xf32> to vector<4x648xf32>
    %190 = arith.mulf %188, %189 : vector<4x648xf32>
    %191 = arith.mulf %190, %190 : vector<4x648xf32>
    %cst_99 = arith.constant dense<0.000000e+00> : vector<4xf32>
    %192 = vector.multi_reduction <add>, %191, %cst_99 [1] : vector<4x648xf32> to vector<4xf32>
    %193 = vector.shape_cast %192 : vector<4xf32> to vector<4x1xf32>
    %cst_100 = arith.constant 0.001953125 : f32
    %194 = vector.broadcast %cst_100 : f32 to vector<4x1xf32>
    %195 = arith.mulf %193, %194 : vector<4x1xf32>
    %cst_101 = arith.constant 9.99999974E-6 : f32
    %196 = vector.broadcast %cst_101 : f32 to vector<4x1xf32>
    %197 = arith.addf %195, %196 : vector<4x1xf32>
    %198 = math.rsqrt %197 : vector<4x1xf32>
    %199 = arith.mulf %198, %158 : vector<4x1xf32>
    %200 = vector.broadcast %199 : vector<4x1xf32> to vector<4x648xf32>
    %201 = arith.mulf %190, %200 : vector<4x648xf32>
    %202 = vector.broadcast %159 : vector<4x1xf32> to vector<4x648xf32>
    %203 = arith.addf %201, %202 : vector<4x648xf32>
    %204 = arith.addf %203, %112 : vector<4x648xf32>
    %cst_102 = arith.constant 0.000000e+00 : f32
    %205 = vector.broadcast %cst_102 : f32 to vector<4x648xf32>
    %206 = arith.maximumf %204, %205 : vector<4x648xf32>
    %c0_103 = arith.constant 0 : index
    %c0_104 = arith.constant 0 : index
    %207 = vector.load %arg8[%c0_103, %c0_104] : memref<4x648xf32, #tpu.memory_space<vmem>>, vector<4x648xf32>
    tpu.vector_store %arg8[%c0_103, %c0_104], %206 {strides = array<i32>} : memref<4x648xf32, #tpu.memory_space<vmem>>, vector<4x648xf32>,
    return
  }
}

</mosaic_0001>

<bundles_post_ra>
// kernel: tpu_custom_call.1
= control target key start
LH: loop header
LB: loop body
LE: loop exit
PB: predicated region body
PF: predicated region fallthrough
CT: control target
= control target key end

     0   :  { %13 = vsyncpa [#allocation5], 0  ;;  %s2781_s0 = inlined_call_operand.hbm [shape: f32[2,4,16,16], index: 0, kind: input, shape index: {}]   ;;  %s2782_s1 = inlined_call_operand.vmem [shape: f32[1,648], index: 1, kind: input, shape index: {}]   ;;  %s2783_s2 = inlined_call_operand.vmem [shape: f32[4,36], index: 2, kind: input, shape index: {}]   ;;  %s2784_s3 = inlined_call_operand.vmem [shape: f32[4,36], index: 3, kind: input, shape index: {}]   ;;  %s2785_s4 = inlined_call_operand.vmem [shape: f32[4,1], index: 4, kind: input, shape index: {}]   ;;  %s2786_s5 = inlined_call_operand.vmem [shape: f32[4,1], index: 5, kind: input, shape index: {}]   ;;  %s2787_s6 = inlined_call_operand.vmem [shape: f32[4,1], index: 6, kind: input, shape index: {}]   ;;  %s2788_s7 = inlined_call_operand.vmem [shape: f32[4,1], index: 7, kind: input, shape index: {}]   ;;  %s2789_s8 = inlined_call_operand.hbm [shape: f32[4,648], index: 8, kind: output, shape index: {}]  }
   0x1   :  { %14 = vsyncpa [#allocation6], 0  ;;  %s1860_s27 = smov [#allocation4]   ;;  %s1812_s9 = scalar_lea.hbm %s2781_s0, 2048 }
   0x2   :  { %s20_s28 = sshll.u32 %s1860_s27, 4  ;;  %p1813_p0 = scmp.ne.s32.totalorder %s2781_s0, %s1812_s9  ;;  %s21_s28 = int_to_ptr.vmem [resolvable:$true] %s20_s28 }
   0x3   :  { %p1816_p1 = scmp.lt.u32.totalorder %s1812_s9, %s2781_s0 }
   0x5   :  { %p1818_p2 = pnand %p1816_p1, %p1813_p0 }
   0x7   :  { %1821 = shalt.err (!%p1818_p2)
}
   0x8   :  { %s1822_s14 = scalar_lea.vmem %s21_s28, 2048  ;;  %p1827_p4 = scmp.lt.s32.totalorder %s21_s28, %s21_s28 }
   0x9   :  { %p1823_p3 = scmp.ne.s32.totalorder %s21_s28, %s1822_s14  ;;  %p1828_p5 = scmp.lt.s32.totalorder %s1822_s14, %s1822_s14 }
   0xb   :  { %p1829_p6 = por %p1828_p5, %p1827_p4 }
   0xd   :  { %p1830_p7 = pnand %p1829_p6, %p1823_p3 }
   0xf   :  { %1833 = shalt.err (!%p1830_p7)
}
  0x10   :  { %s1861_s15 = smov 128   ;;  %s1862_s16 = smov 8  }
  0x11   :  { %26 = dma.hbm_to_vmem [thread:$0]  %s2781_s0, 2048, %s21_s28, [#allocation5], %s1861_s15, %s1861_s15, %s1862_s16  }
  0x12   :  { %1856 = dma.done.wait [#allocation5], 2048  }
  0x13   :  { %1857 = vsyncadd [#allocation5], 4294965248  ;;  %vm67_vm0 = vcmask 1041409   ;;  %vm69_vm1 = vcmask 1045509   ;;  %vm72_vm2 = vcmask 1042434   ;;  %v1958_v0 = vld [vmem:[#allocation4 + $0x8] sm:$0xff] }
  0x14   :  { %v1960_v1 = vld [vmem:[#allocation4 + $0x18] sm:$0xff]  ;;  %v1962_v2 = vld [vmem:[#allocation4 + $0x28] sm:$0xff]  ;;  %vm74_vm3 = vcmask 1046534   ;;  %vm77_vm4 = vcmask 1043459   ;;  %vm79_vm5 = vcmask 1047559   ;;  %v1863_v3 = vmov 0.0  }
  0x15   :  { %45 = vst [vmem:[#allocation2] sm:$0xff] %v1863_v3  ;;  %46 = vst [vmem:[#allocation2 + $0x8] sm:$0xff] %v1863_v3  ;;  %834 = vmatprep.mubr.f32.mxu0 %v1863_v3  ;;  %905 = vmatprep.mubr.f32.mxu1 %v1863_v3  ;;  %v1969_v4 = vld [vmem:[#allocation4 + $0x38] sm:$0xff]  ;;  %v232_v5 = vrot.slane %v1958_v0, 3  ;;  %v233_v6 = vrot.slane %v1960_v1, 2  ;;  %v236_v7 = vrot.slane %v1962_v2, 1 }
  0x16   :  { %51 = vst [vmem:[#allocation3] sm:$0xff] %v1863_v3  ;;  %v190_v8 = vrot.slane %v1960_v1, 7  ;;  %v1975_v9 = vld [vmem:[#allocation4] sm:$0xff]  ;;  %v1979_v10 = vcombine.high %v1969_v4, %v1969_v4  ;;  %v193_v11 = vrot.slane %v1962_v2, 6  ;;  %v196_v12 = vrot.slane %v1969_v4, 5  ;;  %v1984_v14 = vld [vmem:[#allocation4 + $0x10] sm:$0xff] }
  0x17   :  { %v204_v13 = vrot.slane %v1958_v0, 1  ;;  %v234_v15 = vsel %vm67_vm0, %v233_v6, %v232_v5  ;;  %v207_v17 = vrot.slane %v1962_v2, 7  ;;  %v210_v18 = vrot.slane %v1969_v4, 6  ;;  %v1991_v19 = vld [vmem:[#allocation4 + $0x20] sm:$0xff]  ;;  %v1997_v23 = vld [vmem:[#allocation4 + $0x30] sm:$0xff]  ;;  %s1864_s0 = smov 108  }
  0x18   :  { %v191_v16 = vsel %vm67_vm0, %v190_v8, %v1958_v0  ;;  %v235_v20 = vsel %vm69_vm1, %v233_v6, %v234_v15  ;;  %v2001_v24 = vcombine.high %v1975_v9, %v1975_v9  ;;  %v2009_v28 = vcombine.high %v1984_v14, %v1984_v14  ;;  %v2031_v41 = vld [vmem:[#allocation4 + $0x40] sm:$0xff]  ;;  %s1865_s19 = smov 54   ;;  %v2040_v47 = vld [vmem:[#allocation4 + $0x70] sm:$0xff]  ;;  %s1866_s20 = smov 72  }
  0x19   :  { %v192_v21 = vsel %vm69_vm1, %v190_v8, %v191_v16  ;;  %v205_v22 = vsel %vm67_vm0, %v1960_v1, %v204_v13  ;;  %v237_v25 = vsel %vm72_vm2, %v236_v7, %v235_v20  ;;  %v2016_v32 = vcombine.high %v1991_v19, %v1991_v19  ;;  %v2033_v42 = vld [vmem:[#allocation4 + $0x60] sm:$0xff]  ;;  %v2046_v52 = vld [vmem:[#allocation4 + $0x50] sm:$0xff]  ;;  %s1867_s21 = smov 18   ;;  %s1868_s22 = smov 90  }
  0x1a   :  { %v194_v26 = vsel %vm72_vm2, %v193_v11, %v192_v21  ;;  %v206_v27 = vsel %vm69_vm1, %v1960_v1, %v205_v22  ;;  %v238_v29 = vsel %vm74_vm3, %v236_v7, %v237_v25  ;;  %v2024_v36 = vcombine.high %v1997_v23, %v1997_v23  ;;  %s1869_s23 = smov 36   ;;  %s1870_s24 = smov 124  }
  0x1b   :  { %v195_v30 = vsel %vm74_vm3, %v193_v11, %v194_v26  ;;  %v208_v31 = vsel %vm72_vm2, %v207_v17, %v206_v27  ;;  %v239_v33 = vsel %vm77_vm4, %v1969_v4, %v238_v29  ;;  %v158_v40 = vrot.slane %v2001_v24, 2  ;;  %s1871_s25 = smov 16   ;;  %s1872_s26 = smov 126  }
  0x1c   :  { %v197_v34 = vsel %vm77_vm4, %v196_v12, %v195_v30  ;;  %v209_v35 = vsel %vm74_vm3, %v207_v17, %v208_v31  ;;  %v240_v37 = vsel %vm79_vm5, %v1969_v4, %v239_v33  ;;  %v159_v44 = vrot.slane %v2009_v28, 1  ;;  %s1873_s27 = smov 106   ;;  %s1874_s28 = smov 34  }
  0x1d   :  { %v198_v38 = vsel %vm79_vm5, %v196_v12, %v197_v34  ;;  %v211_v39 = vsel %vm77_vm4, %v210_v18, %v209_v35  ;;  %241 = vrot.lane.b32.xlu0 %v240_v37, %s1864_s0  ;;  %v164_v45 = vrot.slane %v2024_v36, 7  ;;  %v218_v46 = vrot.slane %v1958_v0, 2  ;;  %s1875_s29 = smov 52   ;;  %s1876_s30 = smov 32  }
  0x1e   :  { %199 = vrot.lane.b32.xlu1 %v198_v38, %s1865_s19  ;;  %v212_v43 = vsel %vm79_vm5, %v210_v18, %v211_v39  ;;  %v219_v48 = vrot.slane %v1960_v1, 1  ;;  %v224_v49 = vrot.slane %v1969_v4, 7  ;;  %v172_v50 = vrot.slane %v2001_v24, 3  ;;  %s1877_s9 = smov 14   ;;  %s1878_s10 = smov 50  }
  0x1f   :  { %v173_v51 = vrot.slane %v2009_v28, 2  ;;  %v160_v53 = vsel %vm67_vm0, %v159_v44, %v158_v40  ;;  %v176_v54 = vrot.slane %v2016_v32, 1  ;;  %v338_v55 = vrot.slane %v2031_v41, 1  ;;  %s1879_s11 = smov 38   ;;  %s1880_s12 = smov 68  }
  0x20   :  { %v341_v56 = vrot.slane %v2033_v42, 7  ;;  %v161_v57 = vsel %vm69_vm1, %v159_v44, %v160_v53  ;;  %v220_v58 = vsel %vm67_vm0, %v219_v48, %v218_v46  ;;  %v344_v60 = vrot.slane %v2040_v47, 6  ;;  %s1881_s13 = smov 122   ;;  %s1882_s14 = smov 56  }
  0x21   :  { %v174_v59 = vsel %vm67_vm0, %v173_v51, %v172_v50  ;;  %v162_v61 = vsel %vm72_vm2, %v2016_v32, %v161_v57  ;;  %v221_v62 = vsel %vm69_vm1, %v219_v48, %v220_v58  ;;  %v339_v4 = vsel %vm67_vm0, %v2046_v52, %v338_v55  ;;  %s1883_s15 = smov 86   ;;  %s1884_s16 = smov 74  }
  0x22   :  { %213 = vrot.lane.b32.xlu1 %v212_v43, %s1866_s20  ;;  %v175_v63 = vsel %vm69_vm1, %v173_v51, %v174_v59  ;;  %v163_v5 = vsel %vm74_vm3, %v2016_v32, %v162_v61  ;;  %v222_v6 = vsel %vm72_vm2, %v1962_v2, %v221_v62  ;;  %v340_v8 = vsel %vm69_vm1, %v2046_v52, %v339_v4  ;;  %s1885_s17 = smov 104   ;;  %s1886_s18 = smov 92  }
  0x23   :  { %v177_v7 = vsel %vm72_vm2, %v176_v54, %v175_v63  ;;  %v165_v11 = vsel %vm77_vm4, %v164_v45, %v163_v5  ;;  %v223_v12 = vsel %vm74_vm3, %v1962_v2, %v222_v6  ;;  %v342_v15 = vsel %vm72_vm2, %v341_v56, %v340_v8  ;;  %s1887_s19 = smov 110   ;;  %s1888_s20 = smov 12  }
  0x24   :  { %v178_v13 = vsel %vm74_vm3, %v176_v54, %v177_v7  ;;  %v166_v16 = vsel %vm79_vm5, %v164_v45, %v165_v11  ;;  %v225_v17 = vsel %vm77_vm4, %v224_v49, %v223_v12  ;;  %v343_v20 = vsel %vm74_vm3, %v341_v56, %v342_v15 }
  0x25   :  { %v179_v18 = vsel %vm77_vm4, %v2024_v36, %v178_v13  ;;  %167 = vrot.lane.b32.xlu0 %v166_v16, %s1867_s21  ;;  %v226_v21 = vsel %vm79_vm5, %v224_v49, %v225_v17  ;;  %v345_v25 = vsel %vm77_vm4, %v344_v60, %v343_v20  ;;  %v246_v26 = vcombine.high %v1958_v0, %v1958_v0  ;;  %s1889_s21 = smov 30  }
  0x26   :  { %v180_v22 = vsel %vm79_vm5, %v2024_v36, %v179_v18  ;;  %227 = vrot.lane.b32.xlu1 %v226_v21, %s1868_s22  ;;  %v346_v27 = vsel %vm79_vm5, %v344_v60, %v345_v25  ;;  %v247_v29 = vcombine.high %v1960_v1, %v1960_v1  ;;  %v2091_v30 = vcombine.high %v1962_v2, %v1962_v2 }
  0x27   :  { %v256_v31 = vrot.slane %v1979_v10, 5  ;;  %v269_v33 = vrot.slane %v246_v26, 1  ;;  %v275_v34 = vrot.slane %v1979_v10, 6  ;;  %v283_v35 = vrot.slane %v246_v26, 2 }
  0x28   :  { %v289_v0 = vrot.slane %v1979_v10, 7  ;;  %v250_v37 = vrot.slane %v247_v29, 7  ;;  %v253_v38 = vrot.slane %v2091_v30, 6  ;;  %v272_v39 = vrot.slane %v2091_v30, 7 }
  0x29   :  { %v284_v40 = vrot.slane %v247_v29, 1  ;;  %181 = vrot.lane.b32.xlu0 %v180_v22, %s1869_s23  ;;  %v270_v1 = vsel %vm67_vm0, %v247_v29, %v269_v33  ;;  %v324_v2 = vrot.slane %v2046_v52, 7  ;;  %v327_v43 = vrot.slane %v2033_v42, 6  ;;  %s1890_s23 = smov 48  }
  0x2a   :  { %v330_v44 = vrot.slane %v2040_v47, 5  ;;  %347 = vrot.lane.b32.xlu1 %v346_v27, %s1870_s24  ;;  %v251_v45 = vsel %vm67_vm0, %v250_v37, %v246_v26  ;;  %v271_v46 = vsel %vm69_vm1, %v247_v29, %v270_v1  ;;  %v297_v49 = vrot.slane %v246_v26, 3  ;;  %s1891_s24 = smov 66  }
  0x2b   :  { %v285_v48 = vsel %vm67_vm0, %v284_v40, %v283_v35  ;;  %v252_v50 = vsel %vm69_vm1, %v250_v37, %v251_v45  ;;  %v273_v51 = vsel %vm72_vm2, %v272_v39, %v271_v46  ;;  %v325_v54 = vsel %vm67_vm0, %v324_v2, %v2031_v41 }
  0x2c   :  { %v286_v53 = vsel %vm69_vm1, %v284_v40, %v285_v48  ;;  %v254_v55 = vsel %vm72_vm2, %v253_v38, %v252_v50  ;;  %v274_v56 = vsel %vm74_vm3, %v272_v39, %v273_v51  ;;  %v326_v58 = vsel %vm69_vm1, %v324_v2, %v325_v54  ;;  %v2178_v50 = vld [vmem:[#allocation4 + $0x58] sm:$0xff] }
  0x2d   :  { %v287_v57 = vsel %vm72_vm2, %v2091_v30, %v286_v53  ;;  %v255_v59 = vsel %vm74_vm3, %v253_v38, %v254_v55  ;;  %v276_v60 = vsel %vm77_vm4, %v275_v34, %v274_v56  ;;  %v328_v62 = vsel %vm72_vm2, %v327_v43, %v326_v58  ;;  %v2185_v53 = vld [vmem:[#allocation4 + $0x68] sm:$0xff] }
  0x2e   :  { %v288_v61 = vsel %vm74_vm3, %v2091_v30, %v287_v57  ;;  %v257_v63 = vsel %vm77_vm4, %v256_v31, %v255_v59  ;;  %v277_v4 = vsel %vm79_vm5, %v275_v34, %v276_v60  ;;  %v329_v6 = vsel %vm74_vm3, %v327_v43, %v328_v62  ;;  %v2191_v58 = vld [vmem:[#allocation4 + $0x48] sm:$0xff] }
  0x2f   :  { %v290_v5 = vsel %vm77_vm4, %v289_v0, %v288_v61  ;;  %v258_v7 = vsel %vm79_vm5, %v256_v31, %v257_v63  ;;  %278 = vrot.lane.b32.xlu1 %v277_v4, %s1871_s25  ;;  %v331_v11 = vsel %vm77_vm4, %v330_v44, %v329_v6  ;;  %v298_v12 = vrot.slane %v247_v29, 2  ;;  %v2202_v6 = vld [vmem:[#allocation4 + $0x78] sm:$0xff]  ;;  %s1892_s25 = smov 120  }
  0x30   :  { %v291_v8 = vsel %vm79_vm5, %v289_v0, %v290_v5  ;;  %259 = vrot.lane.b32.xlu0 %v258_v7, %s1872_s26  ;;  %v332_v13 = vsel %vm79_vm5, %v330_v44, %v331_v11  ;;  %v301_v15 = vrot.slane %v2091_v30, 1  ;;  %v371_v16 = vrot.slane %v2031_v41, 3 }
  0x31   :  { %v372_v17 = vrot.slane %v2046_v52, 2  ;;  %v299_v18 = vsel %vm67_vm0, %v298_v12, %v297_v49  ;;  %v375_v20 = vrot.slane %v2033_v42, 1  ;;  %v357_v21 = vrot.slane %v2031_v41, 2 }
  0x32   :  { %v358_v22 = vrot.slane %v2046_v52, 1  ;;  %v300_v25 = vsel %vm69_vm1, %v298_v12, %v299_v18  ;;  %v363_v27 = vrot.slane %v2040_v47, 7  ;;  %v2141_v29 = vcombine.high %v2031_v41, %v2031_v41 }
  0x33   :  { %v373_v26 = vsel %vm67_vm0, %v372_v17, %v371_v16  ;;  %333 = vrot.lane.b32.xlu1 %v332_v13, %s1873_s27  ;;  %v302_v30 = vsel %vm72_vm2, %v301_v15, %v300_v25  ;;  %v2148_v34 = vcombine.high %v2046_v52, %v2046_v52  ;;  %v2155_v37 = vcombine.high %v2033_v42, %v2033_v42  ;;  %s1893_s27 = smov 84  }
  0x34   :  { %v374_v31 = vsel %vm69_vm1, %v372_v17, %v373_v26  ;;  %v359_v33 = vsel %vm67_vm0, %v358_v22, %v357_v21  ;;  %292 = vrot.lane.b32.xlu0 %v291_v8, %s1874_s28  ;;  %v303_v35 = vsel %vm74_vm3, %v301_v15, %v302_v30  ;;  %v2164_v40 = vcombine.high %v2040_v47, %v2040_v47  ;;  %s1894_s28 = smov 102  }
  0x35   :  { %v376_v0 = vsel %vm72_vm2, %v375_v20, %v374_v31  ;;  %v360_v41 = vsel %vm69_vm1, %v358_v22, %v359_v33  ;;  %v304_v38 = vsel %vm77_vm4, %v1979_v10, %v303_v35  ;;  %v389_v44 = vrot.slane %v2148_v34, 7 }
  0x36   :  { %v377_v39 = vsel %vm74_vm3, %v375_v20, %v376_v0  ;;  %v361_v52 = vsel %vm72_vm2, %v2033_v42, %v360_v41  ;;  %v305_v1 = vsel %vm79_vm5, %v1979_v10, %v304_v38  ;;  %v392_v48 = vrot.slane %v2155_v37, 6 }
  0x37   :  { %v378_v2 = vsel %vm77_vm4, %v2040_v47, %v377_v39  ;;  %v362_v43 = vsel %vm74_vm3, %v2033_v42, %v361_v52  ;;  %v395_v49 = vrot.slane %v2164_v40, 5  ;;  %v390_v42 = vsel %vm67_vm0, %v389_v44, %v2141_v29 }
  0x38   :  { %v379_v45 = vsel %vm79_vm5, %v2040_v47, %v378_v2  ;;  %v364_v46 = vsel %vm77_vm4, %v363_v27, %v362_v43  ;;  %306 = vrot.lane.b32.xlu0 %v305_v1, %s1875_s29  ;;  %v66_v51 = vrot.slane %v1984_v14, 7  ;;  %v71_v47 = vrot.slane %v1991_v19, 6  ;;  %s1895_s29 = smov 127  }
  0x39   :  { %380 = vrot.lane.b32.xlu1 %v379_v45, %s1876_s30  ;;  %v365_v10 = vsel %vm79_vm5, %v363_v27, %v364_v46  ;;  %v391_v54 = vsel %vm69_vm1, %v389_v44, %v390_v42  ;;  %v76_v55 = vrot.slane %v1997_v23, 5  ;;  %v403_v56 = vrot.slane %v2141_v29, 1  ;;  %s1896_s30 = smov 109  }
  0x3a   :  { %v406_v57 = vrot.slane %v2155_v37, 7  ;;  %v393_v59 = vsel %vm72_vm2, %v392_v48, %v391_v54  ;;  %v68_v60 = vsel %vm67_vm0, %v66_v51, %v1975_v9  ;;  %v409_v61 = vrot.slane %v2164_v40, 6 }
  0x3b   :  { %v449_v62 = vrot.slane %v2178_v50, 7  ;;  %v394_v63 = vsel %vm74_vm3, %v392_v48, %v393_v59  ;;  %v70_v4 = vsel %vm69_vm1, %v66_v51, %v68_v60  ;;  %v404_v5 = vsel %vm67_vm0, %v2148_v34, %v403_v56 }
  0x3c   :  { %v452_v7 = vrot.slane %v2185_v53, 6  ;;  %366 = vrot.lane.b32.xlu0 %v365_v10, %s1877_s9  ;;  %v396_v8 = vsel %vm77_vm4, %v395_v49, %v394_v63  ;;  %v73_v11 = vsel %vm72_vm2, %v71_v47, %v70_v4  ;;  %v405_v12 = vsel %vm69_vm1, %v2148_v34, %v404_v5  ;;  %s1897_s9 = smov 91  }
  0x3d   :  { %v450_v13 = vsel %vm67_vm0, %v449_v62, %v2191_v58  ;;  %v397_v15 = vsel %vm79_vm5, %v395_v49, %v396_v8  ;;  %v75_v16 = vsel %vm74_vm3, %v71_v47, %v73_v11  ;;  %v407_v17 = vsel %vm72_vm2, %v406_v57, %v405_v12 }
  0x3e   :  { %v451_v18 = vsel %vm69_vm1, %v449_v62, %v450_v13  ;;  %v78_v20 = vsel %vm77_vm4, %v76_v55, %v75_v16  ;;  %v408_v21 = vsel %vm74_vm3, %v406_v57, %v407_v17  ;;  %v455_v25 = vrot.slane %v2202_v6, 5 }
  0x3f   :  { %v453_v22 = vsel %vm72_vm2, %v452_v7, %v451_v18  ;;  %v80_v26 = vsel %vm79_vm5, %v76_v55, %v78_v20  ;;  %v410_v27 = vsel %vm77_vm4, %v409_v61, %v408_v21  ;;  %v86_v31 = vrot.slane %v1975_v9, 1 }
  0x40   :  { %v454_v30 = vsel %vm74_vm3, %v452_v7, %v453_v22  ;;  %398 = vrot.lane.b32.xlu0 %v397_v15, %s1878_s10  ;;  %81 = vrot.lane.b32.xlu1 %v80_v26, %s1879_s11  ;;  %v411_v33 = vsel %vm79_vm5, %v409_v61, %v410_v27  ;;  %v89_v0 = vrot.slane %v1991_v19, 7  ;;  %v92_v41 = vrot.slane %v1997_v23, 6 }
  0x41   :  { %v456_v35 = vsel %vm77_vm4, %v455_v25, %v454_v30  ;;  %v87_v39 = vsel %vm67_vm0, %v1984_v14, %v86_v31  ;;  %v417_v52 = vrot.slane %v2141_v29, 2  ;;  %v418_v1 = vrot.slane %v2148_v34, 1 }
  0x42   :  { %v457_v38 = vsel %vm79_vm5, %v455_v25, %v456_v35  ;;  %v88_v2 = vsel %vm69_vm1, %v1984_v14, %v87_v39  ;;  %v423_v43 = vrot.slane %v2164_v40, 7  ;;  %v100_v44 = vrot.slane %v1975_v9, 2 }
  0x43   :  { %v101_v45 = vrot.slane %v1984_v14, 1  ;;  %v90_v46 = vsel %vm72_vm2, %v89_v0, %v88_v2  ;;  %v419_v48 = vsel %vm67_vm0, %v418_v1, %v417_v52  ;;  %v106_v49 = vrot.slane %v1997_v23, 7 }
  0x44   :  { %v431_v10 = vrot.slane %v2141_v29, 3  ;;  %412 = vrot.lane.b32.xlu0 %v411_v33, %s1880_s12  ;;  %458 = vrot.lane.b32.xlu1 %v457_v38, %s1881_s13  ;;  %v91_v42 = vsel %vm74_vm3, %v89_v0, %v90_v46  ;;  %v420_v51 = vsel %vm69_vm1, %v418_v1, %v419_v48  ;;  %v432_v54 = vrot.slane %v2148_v34, 2 }
  0x45   :  { %v102_v47 = vsel %vm67_vm0, %v101_v45, %v100_v44  ;;  %v93_v55 = vsel %vm77_vm4, %v92_v41, %v91_v42  ;;  %v421_v56 = vsel %vm72_vm2, %v2155_v37, %v420_v51  ;;  %v435_v29 = vrot.slane %v2155_v37, 1 }
  0x46   :  { %v103_v57 = vsel %vm69_vm1, %v101_v45, %v102_v47  ;;  %v94_v59 = vsel %vm79_vm5, %v92_v41, %v93_v55  ;;  %v422_v60 = vsel %vm74_vm3, %v2155_v37, %v421_v56  ;;  %v433_v62 = vsel %vm67_vm0, %v432_v54, %v431_v10 }
  0x47   :  { %v104_v61 = vsel %vm72_vm2, %v1991_v19, %v103_v57  ;;  %v424_v34 = vsel %vm77_vm4, %v423_v43, %v422_v60  ;;  %v434_v4 = vsel %vm69_vm1, %v432_v54, %v433_v62  ;;  %v114_v5 = vrot.slane %v1975_v9, 3 }
  0x48   :  { %v105_v63 = vsel %vm74_vm3, %v1991_v19, %v104_v61  ;;  %95 = vrot.lane.b32.xlu0 %v94_v59, %s1882_s14  ;;  %v425_v7 = vsel %vm79_vm5, %v423_v43, %v424_v34  ;;  %v436_v8 = vsel %vm72_vm2, %v435_v29, %v434_v4  ;;  %v115_v11 = vrot.slane %v1984_v14, 2 }
  0x49   :  { %v107_v37 = vsel %vm77_vm4, %v106_v49, %v105_v63  ;;  %426 = vrot.lane.b32.xlu1 %v425_v7, %s1883_s15  ;;  %v437_v13 = vsel %vm74_vm3, %v435_v29, %v436_v8  ;;  %v118_v15 = vrot.slane %v1991_v19, 1  ;;  %v132_v9 = vrot.slane %v2009_v28, 7 }
  0x4a   :  { %v108_v12 = vsel %vm79_vm5, %v106_v49, %v107_v37  ;;  %v438_v16 = vsel %vm77_vm4, %v2164_v40, %v437_v13  ;;  %v116_v17 = vsel %vm67_vm0, %v115_v11, %v114_v5  ;;  %v135_v18 = vrot.slane %v2016_v32, 6 }
  0x4b   :  { %v138_v20 = vrot.slane %v2024_v36, 5  ;;  %v439_v14 = vsel %vm79_vm5, %v2164_v40, %v438_v16  ;;  %v117_v21 = vsel %vm69_vm1, %v115_v11, %v116_v17  ;;  %v133_v22 = vsel %vm67_vm0, %v132_v9, %v2001_v24 }
  0x4c   :  { %v468_v19 = vrot.slane %v2191_v58, 1  ;;  %109 = vrot.lane.b32.xlu0 %v108_v12, %s1884_s16  ;;  %v119_v25 = vsel %vm72_vm2, %v118_v15, %v117_v21  ;;  %v134_v26 = vsel %vm69_vm1, %v132_v9, %v133_v22  ;;  %v471_v27 = vrot.slane %v2185_v53, 7 }
  0x4d   :  { %v474_v30 = vrot.slane %v2202_v6, 6  ;;  %440 = vrot.lane.b32.xlu1 %v439_v14, %s1885_s17  ;;  %v120_v40 = vsel %vm74_vm3, %v118_v15, %v119_v25  ;;  %v136_v31 = vsel %vm72_vm2, %v135_v18, %v134_v26  ;;  %v482_v35 = vrot.slane %v2191_v58, 2 }
  0x4e   :  { %v469_v33 = vsel %vm67_vm0, %v2178_v50, %v468_v19  ;;  %v121_v0 = vsel %vm77_vm4, %v1997_v23, %v120_v40  ;;  %v137_v41 = vsel %vm74_vm3, %v135_v18, %v136_v31  ;;  %v483_v39 = vrot.slane %v2178_v50, 1 }
  0x4f   :  { %v470_v38 = vsel %vm69_vm1, %v2178_v50, %v469_v33  ;;  %v122_v52 = vsel %vm79_vm5, %v1997_v23, %v121_v0  ;;  %v139_v1 = vsel %vm77_vm4, %v138_v20, %v137_v41  ;;  %v488_v43 = vrot.slane %v2202_v6, 7 }
  0x50   :  { %v472_v2 = vsel %vm72_vm2, %v471_v27, %v470_v38  ;;  %123 = vrot.lane.b32.xlu0 %v122_v52, %s1886_s18  ;;  %v140_v44 = vsel %vm79_vm5, %v138_v20, %v139_v1  ;;  %v484_v46 = vsel %vm67_vm0, %v483_v39, %v482_v35  ;;  %v496_v48 = vrot.slane %v2191_v58, 3 }
  0x51   :  { %v473_v45 = vsel %vm74_vm3, %v471_v27, %v472_v2  ;;  %141 = vrot.lane.b32.xlu1 %v140_v44, %s1887_s19  ;;  %v485_v49 = vsel %vm69_vm1, %v483_v39, %v484_v46  ;;  %v497_v10 = vrot.slane %v2178_v50, 2  ;;  %v500_v42 = vrot.slane %v2185_v53, 1 }
  0x52   :  { %v475_v23 = vsel %vm77_vm4, %v474_v30, %v473_v45  ;;  %v486_v47 = vsel %vm72_vm2, %v2185_v53, %v485_v49  ;;  %v510_v54 = vcombine.high %v2191_v58, %v2191_v58  ;;  %v511_v55 = vcombine.high %v2178_v50, %v2178_v50 }
  0x53   :  { %v476_v51 = vsel %vm79_vm5, %v474_v30, %v475_v23  ;;  %v487_v56 = vsel %vm74_vm3, %v2185_v53, %v486_v47  ;;  %v498_v57 = vsel %vm67_vm0, %v497_v10, %v496_v48  ;;  %v512_v29 = vcombine.high %v2185_v53, %v2185_v53 }
  0x54   :  { %v513_v59 = vcombine.high %v2202_v6, %v2202_v6  ;;  %477 = vrot.lane.b32.xlu0 %v476_v51, %s1888_s20  ;;  %v489_v60 = vsel %vm77_vm4, %v488_v43, %v487_v56  ;;  %v499_v58 = vsel %vm69_vm1, %v497_v10, %v498_v57  ;;  %v514_v61 = vrot.slane %v511_v55, 7 }
  0x55   :  { %v556_v62 = vrot.slane %v510_v54, 3  ;;  %v490_v50 = vsel %vm79_vm5, %v488_v43, %v489_v60  ;;  %v501_v34 = vsel %vm72_vm2, %v500_v42, %v499_v58  ;;  %v517_v63 = vrot.slane %v512_v29, 6 }
  0x56   :  { %v520_v4 = vrot.slane %v513_v59, 5  ;;  %491 = vrot.lane.b32.xlu1 %v490_v50, %s1889_s21  ;;  %v502_v53 = vsel %vm74_vm3, %v500_v42, %v501_v34  ;;  %v515_v5 = vsel %vm67_vm0, %v514_v61, %v510_v54  ;;  %v557_v7 = vrot.slane %v511_v55, 2 }
  0x57   :  { %v560_v37 = vrot.slane %v512_v29, 1  ;;  %v503_v8 = vsel %vm77_vm4, %v2202_v6, %v502_v53  ;;  %v516_v11 = vsel %vm69_vm1, %v514_v61, %v515_v5  ;;  %v528_v12 = vrot.slane %v510_v54, 1 }
  0x58   :  { %v531_v13 = vrot.slane %v512_v29, 7  ;;  %v504_v15 = vsel %vm79_vm5, %v2202_v6, %v503_v8  ;;  %v518_v9 = vsel %vm72_vm2, %v517_v63, %v516_v11  ;;  %v558_v16 = vsel %vm67_vm0, %v557_v7, %v556_v62 }
  0x59   :  { %v534_v17 = vrot.slane %v513_v59, 6  ;;  %505 = vrot.lane.b32.xlu0 %v504_v15, %s1890_s23  ;;  %v519_v18 = vsel %vm74_vm3, %v517_v63, %v518_v9  ;;  %v559_v20 = vsel %vm69_vm1, %v557_v7, %v558_v16  ;;  %v529_v14 = vsel %vm67_vm0, %v511_v55, %v528_v12 }
  0x5a   :  { %v542_v21 = vrot.slane %v510_v54, 2  ;;  %v521_v22 = vsel %vm77_vm4, %v520_v4, %v519_v18  ;;  %v561_v19 = vsel %vm72_vm2, %v560_v37, %v559_v20  ;;  %v530_v6 = vsel %vm69_vm1, %v511_v55, %v529_v14 }
  0x5b   :  { %v543_v25 = vrot.slane %v511_v55, 1  ;;  %v522_v26 = vsel %vm79_vm5, %v520_v4, %v521_v22  ;;  %v562_v27 = vsel %vm74_vm3, %v560_v37, %v561_v19  ;;  %v532_v30 = vsel %vm72_vm2, %v531_v13, %v530_v6 }
  0x5c   :  { %523 = vrot.lane.b32.xlu1 %v522_v26, %s1891_s24  ;;  %v563_v40 = vsel %vm77_vm4, %v513_v59, %v562_v27  ;;  %v533_v31 = vsel %vm74_vm3, %v531_v13, %v532_v30  ;;  %v548_v35 = vrot.slane %v513_v59, 7  ;;  %v149_v1 = vrot.slane %v2016_v32, 7 }
  0x5d   :  { %v544_v33 = vsel %vm67_vm0, %v543_v25, %v542_v21  ;;  %v564_v0 = vsel %vm79_vm5, %v513_v59, %v563_v40  ;;  %v535_v41 = vsel %vm77_vm4, %v534_v17, %v533_v31  ;;  %v146_v2 = vrot.slane %v2001_v24, 1 }
  0x5e   :  { %v545_v38 = vsel %vm69_vm1, %v543_v25, %v544_v33  ;;  %565 = vrot.lane.b32.xlu0 %v564_v0, %s1892_s25  ;;  %v536_v39 = vsel %vm79_vm5, %v534_v17, %v535_v41  ;;  %v152_v45 = vrot.slane %v2024_v36, 6  ;;  %vm156_vm6 = vcmask 125952  }
  0x5f   :  { %v546_v52 = vsel %vm72_vm2, %v512_v29, %v545_v38  ;;  %v147_v46 = vsel %vm67_vm0, %v2009_v28, %v146_v2  ;;  %vm47_vm7 = vcmask 1043456   ;;  %vm48_vm8 = vcmask 375812  }
  0x60   :  { %v547_v43 = vsel %vm74_vm3, %v512_v29, %v546_v52  ;;  %537 = vrot.lane.b32.xlu1 %v536_v39, %s1893_s27  ;;  %v148_v23 = vsel %vm69_vm1, %v2009_v28, %v147_v46  ;;  %vm49_vm9 = vmor %vm48_vm8, %vm47_vm7  ;;  %vm170_vm10 = vcmask 273552   ;;  %vm184_vm11 = vcmask 421152  }
  0x61   :  { %v549_v44 = vsel %vm77_vm4, %v548_v35, %v547_v43  ;;  %v150_v24 = vsel %vm72_vm2, %v149_v1, %v148_v23  ;;  %50 = vst.msk [vmem:[#allocation2 + $0x10] sm:$0xff] %vm49_vm9, %v1863_v3  ;;  %53 = vst.msk [vmem:[#allocation3 + $0x10] sm:$0xff] %vm49_vm9, %v1863_v3  ;;  %vm202_vm12 = vcmask 568752   ;;  %vm216_vm13 = vcmask 716352  }
  0x62   :  { %v550_v48 = vsel %vm79_vm5, %v548_v35, %v549_v44  ;;  %v151_v32 = vsel %vm74_vm3, %v149_v1, %v150_v24  ;;  %vm230_vm14 = vcmask 863952   ;;  %vm244_vm15 = vcmask 1011552  }
  0x63   :  { %551 = vrot.lane.b32.xlu0 %v550_v48, %s1894_s28  ;;  %v153_v49 = vsel %vm77_vm4, %v152_v45, %v151_v32  ;;  %vm265_vm0 = vcmask 1044464   ;;  %vm266_vm1 = vcmask 113668   ;;  %vm262_vm2 = vcmask 1031168  }
  0x64   :  { %v154_v10 = vsel %vm79_vm5, %v152_v45, %v153_v49  ;;  %vm267_vm3 = vmor %vm266_vm1, %vm265_vm0  ;;  %vm281_vm4 = vcmask 257152   ;;  %vm295_vm5 = vcmask 404752   ;;  %vm354_vm8 = vcmask 97284  }
  0x65   :  { %157 = vst.msk [vmem:[#allocation2 + $0x4] sm:$0xf] %vm156_vm6, %v154_v10  ;;  %vm353_vm6 = vcmask 1044448   ;;  %vm309_vm9 = vcmask 552352   ;;  %vm84_vm0 = vcmask 437552   ;;  %vm415_vm1 = vcmask 683552  }
  0x8f   :  { %v242_v36 = vpop.permute.xlu0 %241 }
  0x90   :  { %v200_v28 = vpop.permute.xlu1 %199 }
  0x94   :  { %v214_v42 = vpop.permute.xlu1 %213 }
  0x97   :  { %v168_v51 = vpop.permute.xlu0 %167 }
  0x98   :  { %171 = vst.msk [vmem:[#allocation2 + $0x4] sm:$0xf] %vm170_vm10, %v168_v51  ;;  %v228_v47 = vpop.permute.xlu1 %227  ;;  %vm350_vm10 = vcmask 1014784  }
  0x9b   :  { %v182_v54 = vpop.permute.xlu0 %181 }
  0x9c   :  { %185 = vst.msk [vmem:[#allocation2 + $0x4] sm:$0xf] %vm184_vm11, %v182_v54  ;;  %v348_v55 = vpop.permute.xlu1 %347  ;;  %vm336_vm11 = vcmask 995152  }
  0x9d   :  { %203 = vst.msk [vmem:[#allocation2 + $0x4] sm:$0xf] %vm202_vm12, %v200_v28  ;;  %v349_v58 = vrot.slane %v348_v55, 4  ;;  %vm355_vm12 = vmor %vm354_vm8, %vm353_vm6  ;;  %vm465_vm6 = vcmask 80900   ;;  %vm112_vm8 = vcmask 732752  }
  0x9e   :  { %217 = vst.msk [vmem:[#allocation2 + $0x4] sm:$0xf] %vm216_vm13, %v214_v42  ;;  %vm369_vm13 = vcmask 240752  }
  0x9f   :  { %231 = vst.msk [vmem:[#allocation2 + $0x4] sm:$0xf] %vm230_vm14, %v228_v47  ;;  %v351_v62 = vsel %vm350_vm10, %v349_v58, %v348_v55  ;;  %vm383_vm14 = vcmask 388352   ;;  %vm443_vm10 = vcmask 978752  }
  0xa0   :  { %245 = vst.msk [vmem:[#allocation2 + $0x4] sm:$0xf] %vm244_vm15, %v242_v36  ;;  %vm401_vm15 = vcmask 535952  }
  0xa1   :  { %v279_v3 = vpop.permute.xlu1 %278 }
  0xa2   :  { %v260_v56 = vpop.permute.xlu0 %259 }
  0xa3   :  { %v261_v57 = vrot.slane %v260_v56, 4 }
  0xa5   :  { %v263_v29 = vsel %vm262_vm2, %v261_v57, %v260_v56  ;;  %v334_v60 = vpop.permute.xlu1 %333 }
  0xa6   :  { %268 = vst.msk [vmem:[#allocation2 + $0x4] sm:$0xff] %vm267_vm3, %v263_v29  ;;  %v293_v59 = vpop.permute.xlu0 %292  ;;  %vm98_vm3 = vcmask 585152  }
  0xa7   :  { %282 = vst.msk [vmem:[#allocation2 + $0x8] sm:$0xf] %vm281_vm4, %v279_v3  ;;  %vm429_vm4 = vcmask 831152  }
  0xa8   :  { %296 = vst.msk [vmem:[#allocation2 + $0x8] sm:$0xf] %vm295_vm5, %v293_v59  ;;  %vm464_vm5 = vcmask 1044432  }
  0xaa   :  { %v307_v61 = vpop.permute.xlu0 %306 }
  0xab   :  { %310 = vst.msk [vmem:[#allocation2 + $0x8] sm:$0xf] %vm309_vm9, %v307_v61  ;;  %v381_v50 = vpop.permute.xlu1 %380  ;;  %vm461_vm9 = vcmask 998400  }
  0xac   :  { %337 = vst.msk [vmem:[#allocation2 + $0x8] sm:$0xf] %vm336_vm11, %v334_v60  ;;  %vm466_vm11 = vmor %vm465_vm6, %vm464_vm5  ;;  %vm571_vm5 = vcmask 1044416   ;;  %vm2790_vm6 = vcmask 64516  }
  0xad   :  { %356 = vst.msk [vmem:[#allocation2 + $0x8] sm:$0xff] %vm355_vm12, %v351_v62  ;;  %vm126_vm12 = vcmask 880352  }
  0xae   :  { %v367_v34 = vpop.permute.xlu0 %366 }
  0xaf   :  { %370 = vst.msk [vmem:[#allocation2 + $0xc] sm:$0xf] %vm369_vm13, %v367_v34  ;;  %vm144_vm13 = vcmask 1027952  }
  0xb0   :  { %384 = vst.msk [vmem:[#allocation2 + $0xc] sm:$0xf] %vm383_vm14, %v381_v50  ;;  %vm480_vm14 = vcmask 224352  }
  0xb2   :  { %v399_v63 = vpop.permute.xlu0 %398  ;;  %v82_v4 = vpop.permute.xlu1 %81 }
  0xb3   :  { %402 = vst.msk [vmem:[#allocation2 + $0xc] sm:$0xf] %vm401_vm15, %v399_v63  ;;  %vm494_vm15 = vcmask 371952  }
  0xb4   :  { %85 = vst.msk [vmem:[#allocation2] sm:$0xf] %vm84_vm0, %v82_v4  ;;  %vm508_vm0 = vcmask 519552  }
  0xb6   :  { %v413_v53 = vpop.permute.xlu0 %412  ;;  %v459_v5 = vpop.permute.xlu1 %458 }
  0xb7   :  { %416 = vst.msk [vmem:[#allocation2 + $0xc] sm:$0xf] %vm415_vm1, %v413_v53  ;;  %v460_v8 = vrot.slane %v459_v5, 4  ;;  %vm526_vm1 = vcmask 667152  }
  0xb9   :  { %v462_v13 = vsel %vm461_vm9, %v460_v8, %v459_v5  ;;  %vm573_vm9 = vmor %vm2790_vm6, %vm571_vm5  ;;  %vm1132_vm5 = vcmask 1047556   ;;  %vm1136_vm6 = vcmask 220164  }
  0xba   :  { %v96_v7 = vpop.permute.xlu0 %95 }
  0xbb   :  { %99 = vst.msk [vmem:[#allocation2] sm:$0xf] %vm98_vm3, %v96_v7  ;;  %v427_v37 = vpop.permute.xlu1 %426  ;;  %vm568_vm3 = vcmask 982016  }
  0xbc   :  { %430 = vst.msk [vmem:[#allocation2 + $0xc] sm:$0xf] %vm429_vm4, %v427_v37  ;;  %vm540_vm4 = vcmask 814752  }
  0xbe   :  { %v110_v11 = vpop.permute.xlu0 %109 }
  0xbf   :  { %113 = vst.msk [vmem:[#allocation2] sm:$0xf] %vm112_vm8, %v110_v11  ;;  %v441_v12 = vpop.permute.xlu1 %440  ;;  %vm554_vm8 = vcmask 962352  }
  0xc0   :  { %444 = vst.msk [vmem:[#allocation2 + $0xc] sm:$0xf] %vm443_vm10, %v441_v12  ;;  %vm594_vm10 = vcmask 1039360  }
  0xc1   :  { %467 = vst.msk [vmem:[#allocation2 + $0xc] sm:$0xff] %vm466_vm11, %v462_v13  ;;  %vm623_vm11 = vcmask 900096  }
  0xc2   :  { %v124_v15 = vpop.permute.xlu0 %123 }
  0xc3   :  { %127 = vst.msk [vmem:[#allocation2] sm:$0xf] %vm126_vm12, %v124_v15  ;;  %v142_v9 = vpop.permute.xlu1 %141  ;;  %vm653_vm12 = vcmask 883712  }
  0xc4   :  { %145 = vst.msk [vmem:[#allocation2] sm:$0xf] %vm144_vm13, %v142_v9  ;;  %vm638_vm13 = vcmask 891904  }
  0xc6   :  { %v478_v16 = vpop.permute.xlu0 %477 }
  0xc7   :  { %481 = vst.msk [vmem:[#allocation2 + $0x10] sm:$0xf] %vm480_vm14, %v478_v16  ;;  %vm668_vm14 = vcmask 752640  }
  0xc8   :  { %v2372_v17 = vld [vmem:[#allocation2 + $0x8] sm:$0xff]  ;;  %v492_v18 = vpop.permute.xlu1 %491 }
  0xc9   :  { %586 = vrot.lane.b32.xlu0 %v2372_v17, %s1895_s29  ;;  %495 = vst.msk [vmem:[#allocation2 + $0x10] sm:$0xf] %vm494_vm15, %v492_v18  ;;  %vm683_vm15 = vcmask 744448  }
  0xcb   :  { %v2376_v20 = vld [vmem:[#allocation2] sm:$0xff]  ;;  %v506_v14 = vpop.permute.xlu0 %505 }
  0xcc   :  { %584 = vrot.lane.b32.xlu1 %v2376_v20, %s1895_s29  ;;  %509 = vst.msk [vmem:[#allocation2 + $0x10] sm:$0xf] %vm508_vm0, %v506_v14  ;;  %vm698_vm0 = vcmask 736256  }
  0xcd   :  { %601 = vrot.lane.b32.xlu0 %v2372_v17, %s1872_s26 }
  0xce   :  { %v524_v21 = vpop.permute.xlu1 %523 }
  0xcf   :  { %527 = vst.msk [vmem:[#allocation2 + $0x10] sm:$0xf] %vm526_vm1, %v524_v21  ;;  %vm754_vm1 = vcmask 293888  }
  0xd0   :  { %599 = vrot.lane.b32.xlu1 %v2376_v20, %s1872_s26  ;;  %v566_v22 = vpop.permute.xlu0 %565 }
  0xd1   :  { %615 = vrot.lane.b32.xlu0 %v2372_v17, %s1887_s19  ;;  %v567_v19 = vrot.slane %v566_v22, 4 }
  0xd2   :  { %v538_v6 = vpop.permute.xlu1 %537 }
  0xd3   :  { %v569_v25 = vsel %vm568_vm3, %v567_v19, %v566_v22  ;;  %541 = vst.msk [vmem:[#allocation2 + $0x10] sm:$0xf] %vm540_vm4, %v538_v6  ;;  %vm2791_vm3 = vcmask 60416   ;;  %vm1131_vm4 = vcmask 1043608  }
  0xd4   :  { %613 = vrot.lane.b32.xlu1 %v2376_v20, %s1887_s19 }
  0xd5   :  { %v552_v26 = vpop.permute.xlu0 %551  ;;  %630 = vrot.lane.b32.xlu0 %v2372_v17, %s1896_s30 }
  0xd6   :  { %555 = vst.msk [vmem:[#allocation2 + $0x10] sm:$0xf] %vm554_vm8, %v552_v26  ;;  %vm1122_vm8 = vcmask 154624  }
  0xd7   :  { %574 = vst.msk [vmem:[#allocation2 + $0x10] sm:$0xff] %vm573_vm9, %v569_v25  ;;  %vm1133_vm9 = vmor %vm1132_vm5, %vm1131_vm4 }
  0xd8   :  { %628 = vrot.lane.b32.xlu1 %v2376_v20, %s1896_s30 }
  0xd9   :  { %645 = vrot.lane.b32.xlu0 %v2372_v17, %s1864_s0 }
  0xdc   :  { %643 = vrot.lane.b32.xlu1 %v2376_v20, %s1864_s0 }
  0xdd   :  { %660 = vrot.lane.b32.xlu0 %v2372_v17, %s1886_s18 }
  0xde   :  { %v2403_v27 = vld [vmem:[#allocation2 + $0x10] sm:$0xff] }
  0xe0   :  { %658 = vrot.lane.b32.xlu1 %v2376_v20, %s1886_s18 }
  0xe1   :  { %675 = vrot.lane.b32.xlu0 %v2372_v17, %s1897_s9 }
  0xe4   :  { %673 = vrot.lane.b32.xlu1 %v2376_v20, %s1897_s9 }
  0xe5   :  { %603 = vrot.lane.b32.xlu0 %v2403_v27, %s1872_s26 }
  0xe8   :  { %588 = vrot.lane.b32.xlu1 %v2403_v27, %s1895_s29 }
  0xe9   :  { %632 = vrot.lane.b32.xlu0 %v2403_v27, %s1896_s30 }
  0xec   :  { %617 = vrot.lane.b32.xlu1 %v2403_v27, %s1887_s19 }
  0xed   :  { %662 = vrot.lane.b32.xlu0 %v2403_v27, %s1886_s18 }
  0xf0   :  { %647 = vrot.lane.b32.xlu1 %v2403_v27, %s1864_s0 }
  0xf1   :  { %688 = vrot.lane.b32.xlu0 %v2376_v20, %s1868_s22 }
  0xf4   :  { %677 = vrot.lane.b32.xlu1 %v2403_v27, %s1897_s9 }
  0xf5   :  { %692 = vrot.lane.b32.xlu0 %v2403_v27, %s1868_s22 }
  0xf8   :  { %690 = vrot.lane.b32.xlu1 %v2372_v17, %s1868_s22 }
 0x13b   :  { %v2427_v30 = vpop.permute.xlu0 %586 }
 0x13c   :  { %v591_v0 = vrot.slane %v2427_v30, 4 }
 0x13e   :  { %v585_v40 = vpop.permute.xlu1 %584 }
 0x13f   :  { %v2429_v31 = vpop.permute.xlu0 %601  ;;  %v590_v33 = vrot.slane %v585_v40, 4 }
 0x140   :  { %v606_v39 = vrot.slane %v2429_v31, 4 }
 0x141   :  { %v593_v52 = vsel %vm47_vm7, %v590_v33, %v591_v0 }
 0x142   :  { %v600_v35 = vpop.permute.xlu1 %599  ;;  %v595_v46 = vsel %vm594_vm10, %v585_v40, %v593_v52 }
 0x143   :  { %v2432_v41 = vpop.permute.xlu0 %615  ;;  %v605_v38 = vrot.slane %v600_v35, 4  ;;  %v703_v49 = vcombine.low %v2376_v20, %v595_v46  ;;  %v704_v36 = vcombine.high %v2376_v20, %v595_v46 }
 0x144   :  { %v620_v2 = vrot.slane %v2432_v41, 4 }
 0x145   :  { %v608_v43 = vsel %vm47_vm7, %v605_v38, %v606_v39 }
 0x146   :  { %v614_v1 = vpop.permute.xlu1 %613  ;;  %v609_v23 = vsel %vm262_vm2, %v600_v35, %v608_v43 }
 0x147   :  { %v2442_v44 = vpop.permute.xlu0 %630  ;;  %v619_v45 = vrot.slane %v614_v1, 4 }
 0x148   :  { %v635_v58 = vrot.slane %v2442_v44, 4 }
 0x149   :  { %v622_v48 = vsel %vm47_vm7, %v619_v45, %v620_v2 }
 0x14a   :  { %v624_v24 = vsel %vm623_vm11, %v614_v1, %v622_v48  ;;  %v2450_v32 = vpop.permute.xlu1 %628 }
 0x14b   :  { %v709_v10 = vcombine.low %v609_v23, %v624_v24  ;;  %v2453_v28 = vpop.permute.xlu0 %645  ;;  %v710_v42 = vcombine.high %v609_v23, %v624_v24  ;;  %v634_v57 = vrot.slane %v2450_v32, 4 }
 0x14c   :  { %v650_v56 = vrot.slane %v2453_v28, 4 }
 0x14d   :  { %v1697_v51 = vpack.c.bf16 %v710_v42, %v704_v36  ;;  %v1699_v47 = vpack.c.bf16 %v709_v10, %v703_v49  ;;  %v637_v50 = vsel %vm47_vm7, %v634_v57, %v635_v58 }
 0x14e   :  { %v644_v54 = vpop.permute.xlu1 %643  ;;  %v639_v37 = vsel %vm638_vm13, %v2450_v32, %v637_v50 }
 0x14f   :  { %v2456_v55 = vpop.permute.xlu0 %660  ;;  %1698 = vmatprep.subr.bf16.mxu0 %v1697_v51  ;;  %v649_v3 = vrot.slane %v644_v54, 4 }
 0x150   :  { %1700 = vmatpush1.bf16.msra.mxu0 %v1699_v47  ;;  %v665_v62 = vrot.slane %v2456_v55, 4 }
 0x151   :  { %v652_v61 = vsel %vm47_vm7, %v649_v3, %v650_v56 }
 0x152   :  { %v659_v29 = vpop.permute.xlu1 %658  ;;  %v654_v63 = vsel %vm653_vm12, %v644_v54, %v652_v61 }
 0x153   :  { %v2460_v59 = vpop.permute.xlu0 %675  ;;  %v664_v60 = vrot.slane %v659_v29, 4  ;;  %v715_v11 = vcombine.low %v639_v37, %v654_v63  ;;  %v716_v9 = vcombine.high %v639_v37, %v654_v63 }
 0x154   :  { %v680_v4 = vrot.slane %v2460_v59, 4 }
 0x155   :  { %v667_v53 = vsel %vm47_vm7, %v664_v60, %v665_v62 }
 0x156   :  { %v674_v34 = vpop.permute.xlu1 %673  ;;  %v669_v12 = vsel %vm668_vm14, %v659_v29, %v667_v53 }
 0x157   :  { %v604_v5 = vpop.permute.xlu0 %603  ;;  %v679_v7 = vrot.slane %v674_v34, 4 }
 0x158   :  { %v607_v21 = vrot.slane %v604_v5, 4 }
 0x159   :  { %v682_v8 = vsel %vm47_vm7, %v679_v7, %v680_v4 }
 0x15a   :  { %v684_v13 = vsel %vm683_vm15, %v674_v34, %v682_v8  ;;  %v589_v15 = vpop.permute.xlu1 %588  ;;  %v610_v33 = vsel %vm47_vm7, %v606_v39, %v607_v21  ;;  %v612_v54 = vsel %vm262_vm2, %v604_v5, %v607_v21 }
 0x15b   :  { %v721_v16 = vcombine.low %v669_v12, %v684_v13  ;;  %v722_v18 = vcombine.high %v669_v12, %v684_v13  ;;  %v2474_v20 = vpop.permute.xlu0 %632  ;;  %v592_v14 = vrot.slane %v589_v15, 4  ;;  %v611_v46 = vsel %vm262_vm2, %v2429_v31, %v610_v33 }
 0x15c   :  { %v636_v52 = vrot.slane %v2474_v20, 4 }
 0x15d   :  { %v1701_v22 = vpack.c.bf16 %v722_v18, %v716_v9  ;;  %v1703_v19 = vpack.c.bf16 %v721_v16, %v715_v11  ;;  %v596_v25 = vsel %vm47_vm7, %v591_v0, %v592_v14 }
 0x15e   :  { %v618_v6 = vpop.permute.xlu1 %617  ;;  %v597_v35 = vsel %vm594_vm10, %v2427_v30, %v596_v25  ;;  %v640_v51 = vsel %vm47_vm7, %v635_v58, %v636_v52 }
 0x15f   :  { %v663_v26 = vpop.permute.xlu0 %662  ;;  %v621_v40 = vrot.slane %v618_v6, 4  ;;  %1702 = vmatprep.subr.bf16.mxu0 %v1701_v22  ;;  %v706_v39 = vcombine.high %v2372_v17, %v597_v35  ;;  %v705_v30 = vcombine.low %v2372_v17, %v597_v35  ;;  %v642_v22 = vsel %vm638_vm13, %v2474_v20, %v636_v52  ;;  %v2530_v52 = vld [vmem:[#allocation3] sm:$0xff] }
 0x160   :  { %1704 = vmatpush1.bf16.msra.mxu0 %v1703_v19  ;;  %v666_v1 = vrot.slane %v663_v26, 4  ;;  %v575_v19 = vld [vmem:[%s2783_s2] sm:$0xf] }
 0x161   :  { %v625_v38 = vsel %vm47_vm7, %v620_v2, %v621_v40  ;;  %v627_v17 = vsel %vm623_vm11, %v618_v6, %v621_v40 }
 0x162   :  { %v648_v43 = vpop.permute.xlu1 %647  ;;  %v626_v48 = vsel %vm623_vm11, %v2432_v41, %v625_v38  ;;  %v670_v49 = vsel %vm47_vm7, %v665_v62, %v666_v1  ;;  %v672_v53 = vsel %vm668_vm14, %v663_v26, %v666_v1  ;;  %v714_v5 = vcombine.high %v612_v54, %v627_v17 }
 0x163   :  { %v689_v0 = vpop.permute.xlu0 %688  ;;  %v651_v45 = vrot.slane %v648_v43, 4  ;;  %v712_v23 = vcombine.high %v611_v46, %v626_v48  ;;  %v711_v24 = vcombine.low %v611_v46, %v626_v48  ;;  %v671_v57 = vsel %vm668_vm14, %v2456_v55, %v670_v49  ;;  %v44_v46 = vld [vmem:[%s2782_s1] sm:$0x3f] }
 0x164   :  { %v694_v29 = vrot.slane %v689_v0, 4  ;;  %v713_v12 = vcombine.low %v612_v54, %v627_v17 }
 0x165   :  { %v655_v2 = vsel %vm47_vm7, %v650_v56, %v651_v45  ;;  %v1705_v36 = vpack.c.bf16 %v712_v23, %v706_v39  ;;  %v1707_v42 = vpack.c.bf16 %v711_v24, %v705_v30  ;;  %v641_v56 = vsel %vm638_vm13, %v2442_v44, %v640_v51 }
 0x166   :  { %v678_v10 = vpop.permute.xlu1 %677  ;;  %v656_v41 = vsel %vm653_vm12, %v2453_v28, %v655_v2 }
 0x167   :  { %v693_v47 = vpop.permute.xlu0 %692  ;;  %v681_v31 = vrot.slane %v678_v10, 4  ;;  %1706 = vmatprep.subr.bf16.mxu1 %v1705_v36  ;;  %v718_v61 = vcombine.high %v641_v56, %v656_v41  ;;  %v717_v34 = vcombine.low %v641_v56, %v656_v41 }
 0x168   :  { %1708 = vmatpush1.bf16.msra.mxu1 %v1707_v42  ;;  %v696_v60 = vrot.slane %v693_v47, 4 }
 0x169   :  { %v685_v3 = vsel %vm47_vm7, %v680_v4, %v681_v31  ;;  %v598_v4 = vsel %vm594_vm10, %v589_v15, %v592_v14  ;;  %v687_v7 = vsel %vm683_vm15, %v678_v10, %v681_v31 }
 0x16a   :  { %v691_v58 = vpop.permute.xlu1 %690  ;;  %v686_v28 = vsel %vm683_vm15, %v2460_v59, %v685_v3  ;;  %v657_v59 = vsel %vm653_vm12, %v648_v43, %v651_v45  ;;  %v708_v15 = vcombine.high %v2403_v27, %v598_v4  ;;  %v726_v16 = vcombine.high %v672_v53, %v687_v7 }
 0x16b   :  { %v695_v62 = vrot.slane %v691_v58, 4  ;;  %v724_v50 = vcombine.high %v671_v57, %v686_v28  ;;  %v723_v63 = vcombine.low %v671_v57, %v686_v28  ;;  %v707_v21 = vcombine.low %v2403_v27, %v598_v4 }
 0x16c   :  { %v720_v6 = vcombine.high %v642_v22, %v657_v59  ;;  %v1713_v25 = vpack.c.bf16 %v714_v5, %v708_v15  ;;  %v725_v40 = vcombine.low %v672_v53, %v687_v7  ;;  %v719_v33 = vcombine.low %v642_v22, %v657_v59 }
 0x16d   :  { %v697_v55 = vsel %vm47_vm7, %v694_v29, %v695_v62  ;;  %v700_v37 = vsel %vm47_vm7, %v695_v62, %v696_v60  ;;  %v1709_v8 = vpack.c.bf16 %v724_v50, %v718_v61  ;;  %v1711_v11 = vpack.c.bf16 %v723_v63, %v717_v34 }
 0x16e   :  { %v701_v13 = vsel %vm698_vm0, %v691_v58, %v700_v37  ;;  %v699_v9 = vsel %vm698_vm0, %v689_v0, %v697_v55  ;;  %v1715_v26 = vpack.c.bf16 %v713_v12, %v707_v21  ;;  %v1717_v27 = vpack.c.bf16 %v726_v16, %v720_v6 }
 0x16f   :  { %v728_v18 = vcombine.high %v701_v13, %v701_v13  ;;  %1710 = vmatprep.subr.bf16.mxu1 %v1709_v8  ;;  %v727_v14 = vcombine.high %v699_v9, %v699_v9  ;;  %v702_v35 = vsel %vm698_vm0, %v693_v47, %v696_v60  ;;  %v1719_v38 = vpack.c.bf16 %v725_v40, %v719_v33 }
 0x170   :  { %1712 = vmatpush1.bf16.msra.mxu1 %v1711_v11  ;;  %v729_v1 = vcombine.high %v702_v35, %v702_v35  ;;  %v984_v43 = vlaneseq }
 0x171   :  { %1679 = vmatprep.subr.msk.mxu0 %vm47_vm7, %v727_v14  ;;  %1682 = vmatprep.subr.msk.mxu1 %vm47_vm7, %v728_v18 }
 0x172   :  { %1680 = vmatpush1.msk.msra.mxu0 %vm47_vm7, %v699_v9  ;;  %v985_v0 = vshrl.u32 %v984_v43, 7 }
 0x173   :  { %1681 = vmatmul.mubr.msk.f32.vlgmr.msra.gmra.mrb[0].mxu0 %vm754_vm1, %v575_v19  ;;  %1714 = vmatprep.subr.bf16.mxu0 %v1713_v25 }
 0x174   :  { %1683 = vmatpush1.msk.msra.mxu1 %vm47_vm7, %v701_v13  ;;  %1716 = vmatpush1.bf16.msra.mxu0 %v1715_v26  ;;  %v986_v45 = vsub.s32 0, %v985_v0  ;;  %v990_v48 = vsub.s32 1, %v985_v0  ;;  %v994_v39 = vsub.s32 2, %v985_v0  ;;  %v998_v23 = vsub.s32 3, %v985_v0 }
 0x175   :  { %1718 = vmatprep.subr.bf16.mxu0 %v1717_v27  ;;  %1684 = vmatmul.mubr.msk.f32.vlgmr.msra.gmra.mrb[0].mxu1 %vm754_vm1, %v575_v19  ;;  %v1002_v17 = vsub.s32 4, %v985_v0  ;;  %v1006_v57 = vsub.s32 5, %v985_v0 }
 0x176   :  { %976 = vmatprep.mubr.f32.mxu0 %v2530_v52  ;;  %1390 = vmatprep.mubr.f32.mxu1 %v2530_v52  ;;  %v2541_v30 = vrot.slane %v44_v46, %v986_v45  ;;  %v2543_v24 = vrot.slane %v44_v46, %v990_v48  ;;  %v2545_v2 = vrot.slane %v44_v46, %v994_v39 }
 0x177   :  { %v2547_v10 = vrot.slane %v44_v46, %v998_v23  ;;  %v2557_v61 = vrot.slane %v44_v46, %v1002_v17  ;;  %v2559_v62 = vrot.slane %v44_v46, %v1006_v57 }
 0x178   :  { %1720 = vmatpush1.bf16.msra.mxu0 %v1719_v38 }
 0x179   :  { %1685 = vmatprep.subr.msk.mxu0 %vm47_vm7, %v729_v1 }
 0x17c   :  { %1686 = vmatpush1.msk.msra.mxu0 %vm47_vm7, %v702_v35 }
 0x17d   :  { %1687 = vmatmul.mubr.msk.f32.vlgmr.msra.gmra.mrb[2].mxu0 %vm754_vm1, %v575_v19 }
 0x17e   :  { %1461 = vmatprep.mubr.f32.mxu0 %v2530_v52 }
 0x246   :  { %v836_v49 = vpop.f32.mrb[0].mxu0 }
 0x247   :  { %v1014_v36 = vmul.f32 %v2541_v30, %v836_v49  ;;  %v838_v42 = vpop.f32.mrb[1].mxu0 }
 0x248   :  { %v1015_v51 = vmul.f32 %v2543_v24, %v838_v42  ;;  %v907_v47 = vpop.f32.mrb[0].mxu1 }
 0x249   :  { %v1020_v31 = vsel %vm47_vm7, %v1014_v36, 0.0  ;;  %v1016_v41 = vmul.f32 %v2545_v2, %v907_v47  ;;  %v909_v54 = vpop.f32.mrb[1].mxu1 }
 0x24a   :  { %v1021_v3 = vsel %vm47_vm7, %v1015_v51, 0.0  ;;  %v1017_v56 = vmul.f32 %v2547_v10, %v909_v54  ;;  %v577_v51 = vld [vmem:[%s2786_s5] sm:$0xf] }
 0x24b   :  { %v1022_v29 = vadd.f32 %v1021_v3, %v1020_v31  ;;  %v1023_v60 = vsel %vm47_vm7, %v1016_v41, 0.0 }
 0x24c   :  { %v1025_v58 = vsel %vm47_vm7, %v1017_v56, 0.0 }
 0x24d   :  { %v1024_v28 = vadd.f32 %v1023_v60, %v1022_v29 }
 0x24f   :  { %v1026_v50 = vadd.f32 %v1025_v58, %v1024_v28 }
 0x250   :  { %v978_v34 = vpop.f32.mrb[2].mxu0 }
 0x251   :  { %v1018_v63 = vmul.f32 %v2557_v61, %v978_v34  ;;  %v980_v4 = vpop.f32.mrb[3].mxu0 }
 0x252   :  { %v1019_v53 = vmul.f32 %v2559_v62, %v980_v4 }
 0x253   :  { %v1027_v5 = vsel %vm47_vm7, %v1018_v63, 0.0 }
 0x254   :  { %v1028_v7 = vadd.f32 %v1027_v5, %v1026_v50  ;;  %v1030_v55 = vsel %vm2791_vm3, %v1019_v53, 0.0 }
 0x256   :  { %v1031_v37 = vadd.f32 %v1030_v55, %v1028_v7 }
 0x258   :  { %1032 = vadd.xlane.f32.xlu1 %v1031_v37 }
 0x2e5   :  { %v1033_v8 = vpop.xlane.xlu1 %1032 }
 0x2e6   :  { %v1034_v11 = vmul.f32 0.001953125, %v1033_v8 }
 0x2e8   :  { %v1035_v12 = vsub.f32 %v836_v49, %v1034_v11  ;;  %v1036_v59 = vsub.f32 %v838_v42, %v1034_v11  ;;  %v1037_v13 = vsub.f32 %v907_v47, %v1034_v11  ;;  %v1038_v9 = vsub.f32 %v909_v54, %v1034_v11  ;;  %v576_v54 = vld [vmem:[%s2785_s4] sm:$0xf]  ;;  %s1899_s4 = smov 19  }
 0x2e9   :  { %v1039_v15 = vsub.f32 %v978_v34, %v1034_v11  ;;  %v1040_v16 = vsub.f32 %v980_v4, %v1034_v11  ;;  %v1898_v42 = vmov 0  }
 0x2ea   :  { %v1041_v18 = vmul.f32 %v1035_v12, %v2541_v30  ;;  %v1042_v14 = vmul.f32 %v1036_v59, %v2543_v24  ;;  %v1043_v21 = vmul.f32 %v1037_v13, %v2545_v2  ;;  %v1044_v22 = vmul.f32 %v1038_v9, %v2547_v10  ;;  %1786 = vset.pattern.permute.xlu0 %v1898_v42 }
 0x2eb   :  { %v1045_v19 = vmul.f32 %v1039_v15, %v2557_v61  ;;  %v1046_v40 = vmul.f32 %v1040_v16, %v2559_v62  ;;  %1787 = vset.pattern.permute.xlu1 %v1898_v42 }
 0x2ec   :  { %v1047_v6 = vmul.f32 %v1041_v18, %v1041_v18  ;;  %v1048_v25 = vmul.f32 %v1042_v14, %v1042_v14  ;;  %v1049_v26 = vmul.f32 %v1043_v21, %v1043_v21  ;;  %v1050_v27 = vmul.f32 %v1044_v22, %v1044_v22  ;;  %1083 = vperm.xlu1 %1787, %v577_v51  }
 0x2ed   :  { %v1051_v1 = vmul.f32 %v1045_v19, %v1045_v19  ;;  %v1052_v45 = vmul.f32 %v1046_v40, %v1046_v40 }
 0x2ee   :  { %v1053_v33 = vsel %vm47_vm7, %v1047_v6, 0.0  ;;  %v1054_v35 = vsel %vm47_vm7, %v1048_v25, 0.0  ;;  %v1056_v43 = vsel %vm47_vm7, %v1049_v26, 0.0  ;;  %v1058_v46 = vsel %vm47_vm7, %v1050_v27, 0.0 }
 0x2ef   :  { %v1055_v38 = vadd.f32 %v1054_v35, %v1053_v33  ;;  %v1060_v39 = vsel %vm47_vm7, %v1051_v1, 0.0  ;;  %v1062_v49 = vsel %vm2791_vm3, %v1052_v45, 0.0  ;;  %vm1137_vm3 = vmor %vm1136_vm6, %vm47_vm7 }
 0x2f1   :  { %v1057_v0 = vadd.f32 %v1056_v43, %v1055_v38 }
 0x2f3   :  { %v1059_v48 = vadd.f32 %v1058_v46, %v1057_v0 }
 0x2f5   :  { %v1061_v23 = vadd.f32 %v1060_v39, %v1059_v48 }
 0x2f7   :  { %v1063_v36 = vadd.f32 %v1062_v49, %v1061_v23 }
 0x2f9   :  { %1064 = vadd.xlane.f32.xlu0 %v1063_v36 }
 0x36b   :  { %v1084_v57 = vpop.permute.xlu1 %1083 }
 0x386   :  { %v1065_v47 = vpop.xlane.xlu0 %1064 }
 0x387   :  { %v1066_v31 = vmul.f32 0.001953125, %v1065_v47 }
 0x389   :  { %v1067_v41 = vadd.f32 1e-05, %v1066_v31 }
 0x38b   :  { %1804 = vrsqrt.f32 %v1067_v41 }
 0x395   :  { %v1805_v17 = vpop.eup %1804 }
 0x396   :  { %v1069_v3 = vmul.f32 %v1805_v17, %v576_v54 }
 0x398   :  { %1072 = vperm.xlu0 %1786, %v1069_v3  }
 0x417   :  { %v1073_v56 = vpop.permute.xlu0 %1072 }
 0x418   :  { %v1075_v29 = vmul.f32 %v1073_v56, %v1041_v18  ;;  %v1076_v60 = vmul.f32 %v1073_v56, %v1042_v14  ;;  %v1077_v58 = vmul.f32 %v1073_v56, %v1043_v21  ;;  %v1078_v28 = vmul.f32 %v1073_v56, %v1044_v22 }
 0x419   :  { %v1079_v50 = vmul.f32 %v1073_v56, %v1045_v19  ;;  %v1080_v34 = vmul.f32 %v1073_v56, %v1046_v40 }
 0x41a   :  { %v1086_v63 = vadd.f32 %v1084_v57, %v1075_v29  ;;  %v1087_v4 = vadd.f32 %v1084_v57, %v1076_v60  ;;  %v1088_v53 = vadd.f32 %v1084_v57, %v1077_v58  ;;  %v1089_v5 = vadd.f32 %v1084_v57, %v1078_v28 }
 0x41b   :  { %v1090_v7 = vadd.f32 %v1084_v57, %v1079_v50  ;;  %v1091_v55 = vadd.f32 %v1084_v57, %v1080_v34 }
 0x41c   :  { %v1092_v37 = vmax.f32 %v1086_v63, 0.0  ;;  %v1093_v8 = vmax.f32 %v1087_v4, 0.0  ;;  %v1094_v11 = vmax.f32 %v1088_v53, 0.0  ;;  %v1095_v12 = vmax.f32 %v1089_v5, 0.0 }
 0x41d   :  { %v1096_v9 = vmax.f32 %v1090_v7, 0.0  ;;  %v1097_v14 = vmax.f32 %v1091_v55, 0.0 }
 0x41e   :  { %v1098_v59 = vmul.f32 %v1092_v37, %v2541_v30  ;;  %v1099_v13 = vmul.f32 %v1093_v8, %v2543_v24  ;;  %v1100_v16 = vmul.f32 %v1094_v11, %v2545_v2  ;;  %v1101_v18 = vmul.f32 %v1095_v12, %v2547_v10 }
 0x41f   :  { %v1102_v22 = vmul.f32 %v1096_v9, %v2557_v61  ;;  %v1103_v19 = vmul.f32 %v1097_v14, %v2559_v62 }
 0x420   :  { %v1110_v15 = vcombine.low %v1098_v59, %v1099_v13  ;;  %v1111_v21 = vcombine.low %v1100_v16, %v1101_v18 }
 0x421   :  { %v1112_v6 = vcombine.low %v1102_v22, %v1103_v19 }
 0x422   :  { %1113 = vrot.lane.b32.xlu1 %v1110_v15, %s1899_s4 }
 0x426   :  { %1115 = vrot.lane.b32.xlu1 %v1111_v21, %s1899_s4 }
 0x42a   :  { %1117 = vrot.lane.b32.xlu1 %v1112_v6, %s1899_s4 }
 0x494   :  { %v1114_v25 = vpop.permute.xlu1 %1113 }
 0x495   :  { %v1119_v26 = vrot.slane %v1114_v25, 4 }
 0x497   :  { %v1123_v40 = vsel %vm1122_vm8, %v1119_v26, %v1114_v25 }
 0x498   :  { %1134 = vst.msk [vmem:[#allocation3] sm:$0xff] %vm1133_vm9, %v1123_v40  ;;  %v1116_v27 = vpop.permute.xlu1 %1115 }
 0x499   :  { %v1120_v33 = vrot.slane %v1116_v27, 4 }
 0x49b   :  { %v1124_v35 = vsel %vm47_vm7, %v1119_v26, %v1120_v33 }
 0x49c   :  { %v2592_v38 = vsel %vm1122_vm8, %v1124_v35, %v1116_v27  ;;  %v1118_v1 = vpop.permute.xlu1 %1117 }
 0x49d   :  { %v1121_v43 = vrot.slane %v1118_v1, 4 }
 0x49f   :  { %v1126_v0 = vsel %vm47_vm7, %v1120_v33, %v1121_v43  ;;  %v1142_v45 = vld [vmem:[#allocation3] sm:$0xff] }
 0x4a0   :  { %v1127_v46 = vsel %vm1122_vm8, %v1126_v0, %v1118_v1  ;;  %1176 = vrot.lane.b32.xlu0 %v1142_v45, %s1887_s19  ;;  %1148 = vrot.lane.b32.xlu1 %v1142_v45, %s1895_s29 }
 0x4a1   :  { %1138 = vst.msk [vmem:[#allocation3 + $0x10] sm:$0xff] %vm1137_vm3, %v1127_v46 }
 0x4a4   :  { %1190 = vrot.lane.b32.xlu0 %v1142_v45, %s1896_s30  ;;  %1162 = vrot.lane.b32.xlu1 %v1142_v45, %s1872_s26 }
 0x4a8   :  { %1204 = vrot.lane.b32.xlu0 %v1142_v45, %s1864_s0  ;;  %1150 = vrot.lane.b32.xlu1 %v2592_v38, %s1895_s29  ;;  %v2610_v48 = vld [vmem:[#allocation3 + $0x10] sm:$0xff] }
 0x4ac   :  { %1218 = vrot.lane.b32.xlu0 %v1142_v45, %s1886_s18  ;;  %1164 = vrot.lane.b32.xlu1 %v2592_v38, %s1872_s26 }
 0x4b0   :  { %1232 = vrot.lane.b32.xlu0 %v1142_v45, %s1897_s9  ;;  %1178 = vrot.lane.b32.xlu1 %v2592_v38, %s1887_s19 }
 0x4b4   :  { %1192 = vrot.lane.b32.xlu1 %v2592_v38, %s1896_s30  ;;  %1152 = vrot.lane.b32.xlu0 %v2610_v48, %s1895_s29 }
 0x4b8   :  { %1206 = vrot.lane.b32.xlu1 %v2592_v38, %s1864_s0  ;;  %1180 = vrot.lane.b32.xlu0 %v2610_v48, %s1887_s19 }
 0x4bc   :  { %1220 = vrot.lane.b32.xlu1 %v2592_v38, %s1886_s18  ;;  %1208 = vrot.lane.b32.xlu0 %v2610_v48, %s1864_s0 }
 0x4c0   :  { %1234 = vrot.lane.b32.xlu1 %v2592_v38, %s1897_s9  ;;  %1236 = vrot.lane.b32.xlu0 %v2610_v48, %s1897_s9 }
 0x4c4   :  { %1166 = vrot.lane.b32.xlu1 %v2610_v48, %s1872_s26  ;;  %1248 = vrot.lane.b32.xlu0 %v2592_v38, %s1868_s22 }
 0x4c8   :  { %1194 = vrot.lane.b32.xlu1 %v2610_v48, %s1896_s30 }
 0x4cc   :  { %1222 = vrot.lane.b32.xlu1 %v2610_v48, %s1886_s18 }
 0x4d0   :  { %1246 = vrot.lane.b32.xlu1 %v1142_v45, %s1868_s22 }
 0x4d4   :  { %1250 = vrot.lane.b32.xlu1 %v2610_v48, %s1868_s22 }
 0x512   :  { %v1177_v39 = vpop.permute.xlu0 %1176  ;;  %v1149_v23 = vpop.permute.xlu1 %1148 }
 0x513   :  { %v1154_v54 = vrot.slane %v1149_v23, 4  ;;  %v1182_v60 = vrot.slane %v1177_v39, 4 }
 0x516   :  { %v1191_v49 = vpop.permute.xlu0 %1190  ;;  %v1163_v36 = vpop.permute.xlu1 %1162 }
 0x517   :  { %v1168_v3 = vrot.slane %v1163_v36, 4  ;;  %v1196_v22 = vrot.slane %v1191_v49, 4 }
 0x51a   :  { %v1205_v42 = vpop.permute.xlu0 %1204  ;;  %v1151_v51 = vpop.permute.xlu1 %1150 }
 0x51b   :  { %v1155_v47 = vrot.slane %v1151_v51, 4  ;;  %v1210_v15 = vrot.slane %v1205_v42, 4 }
 0x51d   :  { %v1157_v56 = vsel %vm47_vm7, %v1154_v54, %v1155_v47 }
 0x51e   :  { %v1219_v31 = vpop.permute.xlu0 %1218  ;;  %v2639_v41 = vpop.permute.xlu1 %1164  ;;  %v1158_v50 = vsel %vm594_vm10, %v1149_v23, %v1157_v56 }
 0x51f   :  { %v1169_v17 = vrot.slane %v2639_v41, 4  ;;  %v1261_v7 = vcombine.high %v1142_v45, %v1158_v50  ;;  %v1260_v8 = vcombine.low %v1142_v45, %v1158_v50  ;;  %v1224_v6 = vrot.slane %v1219_v31, 4 }
 0x521   :  { %v1171_v58 = vsel %vm47_vm7, %v1168_v3, %v1169_v17 }
 0x522   :  { %v1233_v57 = vpop.permute.xlu0 %1232  ;;  %v1179_v29 = vpop.permute.xlu1 %1178  ;;  %v1172_v53 = vsel %vm262_vm2, %v1163_v36, %v1171_v58 }
 0x523   :  { %v1183_v28 = vrot.slane %v1179_v29, 4  ;;  %v1238_v35 = vrot.slane %v1233_v57, 4 }
 0x525   :  { %v1185_v34 = vsel %vm47_vm7, %v1182_v60, %v1183_v28 }
 0x526   :  { %v2646_v63 = vpop.permute.xlu0 %1152  ;;  %v2648_v4 = vpop.permute.xlu1 %1192  ;;  %v1186_v5 = vsel %vm623_vm11, %v1177_v39, %v1185_v34 }
 0x527   :  { %v1266_v55 = vcombine.low %v1172_v53, %v1186_v5  ;;  %v1267_v37 = vcombine.high %v1172_v53, %v1186_v5  ;;  %v1156_v16 = vrot.slane %v2646_v63, 4  ;;  %v1197_v18 = vrot.slane %v2648_v4, 4 }
 0x529   :  { %v1721_v11 = vpack.c.bf16 %v1267_v37, %v1261_v7  ;;  %v1723_v59 = vpack.c.bf16 %v1266_v55, %v1260_v8  ;;  %v1159_v26 = vsel %vm47_vm7, %v1155_v47, %v1156_v16  ;;  %v1199_v40 = vsel %vm47_vm7, %v1196_v22, %v1197_v18 }
 0x52a   :  { %v2652_v12 = vpop.permute.xlu1 %1206  ;;  %v2654_v13 = vpop.permute.xlu0 %1180  ;;  %v1200_v46 = vsel %vm638_vm13, %v1191_v49, %v1199_v40  ;;  %v1160_v39 = vsel %vm594_vm10, %v1151_v51, %v1159_v26 }
 0x52b   :  { %1722 = vmatprep.subr.bf16.mxu1 %v1721_v11  ;;  %v1211_v9 = vrot.slane %v2652_v12, 4  ;;  %v1184_v27 = vrot.slane %v2654_v13, 4  ;;  %v1262_v49 = vcombine.low %v2592_v38, %v1160_v39  ;;  %v1263_v37 = vcombine.high %v2592_v38, %v1160_v39 }
 0x52c   :  { %1724 = vmatpush1.bf16.msra.mxu1 %v1723_v59 }
 0x52d   :  { %v1213_v19 = vsel %vm47_vm7, %v1210_v15, %v1211_v9  ;;  %v1187_v23 = vsel %vm47_vm7, %v1183_v28, %v1184_v27 }
 0x52e   :  { %v1221_v14 = vpop.permute.xlu1 %1220  ;;  %v2660_v25 = vpop.permute.xlu0 %1208  ;;  %v1214_v0 = vsel %vm653_vm12, %v1205_v42, %v1213_v19 }
 0x52f   :  { %v1225_v21 = vrot.slane %v1221_v14, 4  ;;  %v1272_v3 = vcombine.low %v1200_v46, %v1214_v0  ;;  %v1273_v58 = vcombine.high %v1200_v46, %v1214_v0  ;;  %v1212_v51 = vrot.slane %v2660_v25, 4 }
 0x531   :  { %v1227_v1 = vsel %vm47_vm7, %v1224_v6, %v1225_v21  ;;  %v1215_v22 = vsel %vm47_vm7, %v1211_v9, %v1212_v51 }
 0x532   :  { %v1235_v33 = vpop.permute.xlu1 %1234  ;;  %v1228_v47 = vsel %vm668_vm14, %v1219_v31, %v1227_v1  ;;  %v1237_v56 = vpop.permute.xlu0 %1236 }
 0x533   :  { %v1239_v43 = vrot.slane %v1235_v33, 4  ;;  %v1240_v28 = vrot.slane %v1237_v56, 4 }
 0x535   :  { %v1241_v45 = vsel %vm47_vm7, %v1238_v35, %v1239_v43  ;;  %v1243_v19 = vsel %vm47_vm7, %v1239_v43, %v1240_v28 }
 0x536   :  { %v1167_v36 = vpop.permute.xlu1 %1166  ;;  %v1242_v54 = vsel %vm683_vm15, %v1233_v57, %v1241_v45  ;;  %v1188_v57 = vsel %vm623_vm11, %v1179_v29, %v1187_v23  ;;  %v1249_v26 = vpop.permute.xlu0 %1248  ;;  %v1244_v38 = vsel %vm683_vm15, %v1235_v33, %v1243_v19 }
 0x537   :  { %v1170_v60 = vrot.slane %v1167_v36, 4  ;;  %v1278_v50 = vcombine.low %v1228_v47, %v1242_v54  ;;  %v1279_v34 = vcombine.high %v1228_v47, %v1242_v54  ;;  %v1253_v35 = vrot.slane %v1249_v26, 4 }
 0x538   :  { %v1245_v54 = vsel %vm683_vm15, %v1237_v56, %v1240_v28  ;;  %v1139_v56 = vld [vmem:[%s2784_s3] sm:$0xf] }
 0x539   :  { %v1173_v42 = vsel %vm47_vm7, %v1169_v17, %v1170_v60  ;;  %v1725_v53 = vpack.c.bf16 %v1279_v34, %v1273_v58  ;;  %v1727_v5 = vpack.c.bf16 %v1278_v50, %v1272_v3  ;;  %v1175_v9 = vsel %vm262_vm2, %v1167_v36, %v1170_v60 }
 0x53a   :  { %v1195_v7 = vpop.permute.xlu1 %1194  ;;  %v1174_v31 = vsel %vm262_vm2, %v2639_v41, %v1173_v42  ;;  %v1217_v42 = vsel %vm653_vm12, %v2660_v25, %v1212_v51  ;;  %vm2792_vm2 = vcmask 60416  }
 0x53b   :  { %v1198_v55 = vrot.slane %v1195_v7, 4  ;;  %1726 = vmatprep.subr.bf16.mxu1 %v1725_v53  ;;  %v1268_v8 = vcombine.low %v1174_v31, %v1188_v57  ;;  %v1269_v11 = vcombine.high %v1174_v31, %v1188_v57  ;;  %vm2793_vm6 = vmmov %vm2792_vm2 }
 0x53c   :  { %1728 = vmatpush1.bf16.msra.mxu1 %v1727_v5 }
 0x53d   :  { %v1201_v17 = vsel %vm47_vm7, %v1197_v18, %v1198_v55  ;;  %v1729_v59 = vpack.c.bf16 %v1269_v11, %v1263_v37  ;;  %v1731_v15 = vpack.c.bf16 %v1268_v8, %v1262_v49  ;;  %v1216_v18 = vsel %vm653_vm12, %v2652_v12, %v1215_v22 }
 0x53e   :  { %v1223_v6 = vpop.permute.xlu1 %1222  ;;  %v1202_v29 = vsel %vm638_vm13, %v2648_v4, %v1201_v17  ;;  %v1161_v4 = vsel %vm594_vm10, %v2646_v63, %v1156_v16  ;;  %v1203_v60 = vsel %vm638_vm13, %v1195_v7, %v1198_v55  ;;  %vm2794_vm10 = vcmask 64516  }
 0x53f   :  { %v1226_v41 = vrot.slane %v1223_v6, 4  ;;  %1730 = vmatprep.subr.bf16.mxu0 %v1729_v59  ;;  %v1274_v0 = vcombine.low %v1202_v29, %v1216_v18  ;;  %v1275_v46 = vcombine.high %v1202_v29, %v1216_v18  ;;  %v1265_v63 = vcombine.high %v2610_v48, %v1161_v4 }
 0x540   :  { %1732 = vmatpush1.bf16.msra.mxu0 %v1731_v15  ;;  %v1277_v53 = vcombine.high %v1203_v60, %v1217_v42  ;;  %v1276_v31 = vcombine.low %v1203_v60, %v1217_v42 }
 0x541   :  { %v1229_v40 = vsel %vm47_vm7, %v1225_v21, %v1226_v41  ;;  %v1189_v21 = vsel %vm623_vm11, %v2654_v13, %v1184_v27  ;;  %v1231_v12 = vsel %vm668_vm14, %v1223_v6, %v1226_v41  ;;  %v1264_v27 = vcombine.low %v2610_v48, %v1161_v4  ;;  %vm1662_vm11 = vmor %vm2794_vm10, %vm47_vm7 }
 0x542   :  { %v1247_v1 = vpop.permute.xlu1 %1246  ;;  %v1230_v43 = vsel %vm668_vm14, %v1221_v14, %v1229_v40  ;;  %v1271_v33 = vcombine.high %v1175_v9, %v1189_v21  ;;  %v1270_v3 = vcombine.low %v1175_v9, %v1189_v21  ;;  %v1283_v16 = vcombine.high %v1231_v12, %v1245_v54 }
 0x543   :  { %v1252_v45 = vrot.slane %v1247_v1, 4  ;;  %v1280_v39 = vcombine.low %v1230_v43, %v1244_v38  ;;  %v1281_v23 = vcombine.high %v1230_v43, %v1244_v38  ;;  %v1282_v7 = vcombine.low %v1231_v12, %v1245_v54 }
 0x544   :  { %v1737_v49 = vpack.c.bf16 %v1271_v33, %v1265_v63  ;;  %v1739_v28 = vpack.c.bf16 %v1270_v3, %v1264_v27  ;;  %v1741_v51 = vpack.c.bf16 %v1283_v16, %v1277_v53 }
 0x545   :  { %v1255_v36 = vsel %vm47_vm7, %v1252_v45, %v1253_v35  ;;  %v1733_v47 = vpack.c.bf16 %v1281_v23, %v1275_v46  ;;  %v1735_v14 = vpack.c.bf16 %v1280_v39, %v1274_v0  ;;  %v1743_v55 = vpack.c.bf16 %v1282_v7, %v1276_v31 }
 0x546   :  { %v1256_v58 = vsel %vm698_vm0, %v1247_v1, %v1255_v36  ;;  %v1251_v50 = vpop.permute.xlu1 %1250 }
 0x547   :  { %v1284_v34 = vcombine.high %v1256_v58, %v1256_v58  ;;  %v1254_v13 = vrot.slane %v1251_v50, 4  ;;  %1734 = vmatprep.subr.bf16.mxu0 %v1733_v47 }
 0x548   :  { %1736 = vmatpush1.bf16.msra.mxu0 %v1735_v14 }
 0x549   :  { %v1257_v5 = vsel %vm47_vm7, %v1253_v35, %v1254_v13  ;;  %1688 = vmatprep.subr.msk.mxu1 %vm47_vm7, %v1284_v34  ;;  %v1259_v57 = vsel %vm698_vm0, %v1251_v50, %v1254_v13 }
 0x54a   :  { %1689 = vmatpush1.msk.msra.mxu1 %vm47_vm7, %v1256_v58  ;;  %v1258_v48 = vsel %vm698_vm0, %v1249_v26, %v1257_v5  ;;  %v1286_v37 = vcombine.high %v1259_v57, %v1259_v57 }
 0x54b   :  { %1690 = vmatmul.mubr.msk.f32.vlgmr.msra.gmra.mrb[2].mxu1 %vm754_vm1, %v1139_v56  ;;  %1738 = vmatprep.subr.bf16.mxu1 %v1737_v49  ;;  %v1285_v25 = vcombine.high %v1258_v48, %v1258_v48 }
 0x54c   :  { %1740 = vmatpush1.bf16.msra.mxu1 %v1739_v28  ;;  %1532 = vmatprep.mubr.f32.mxu1 %v2530_v52 }
 0x54d   :  { %1691 = vmatprep.subr.msk.mxu0 %vm47_vm7, %v1285_v25  ;;  %1742 = vmatprep.subr.bf16.mxu1 %v1741_v51  ;;  %v1809_v25 = vld [vmem:[#allocation2 + $0x8] sm:$0xff] }
 0x54e   :  { %1692 = vmatpush1.msk.msra.mxu0 %vm47_vm7, %v1258_v48  ;;  %v1141_v48 = vld [vmem:[%s2788_s7] sm:$0xf]  ;;  %v1617_v51 = vcombine.high %v1809_v25, %v1809_v25 }
 0x54f   :  { %1693 = vmatmul.mubr.msk.f32.vlgmr.msra.gmra.mrb[4].mxu0 %vm754_vm1, %v1139_v56 }
 0x550   :  { %1744 = vmatpush1.bf16.msra.mxu1 %v1743_v55 }
 0x551   :  { %1694 = vmatprep.subr.msk.mxu1 %vm47_vm7, %v1286_v37  ;;  %v1140_v37 = vld [vmem:[%s2787_s6] sm:$0xf]  ;;  %s1900_s6 = smov [#allocation7]  }
 0x552   :  { %s1670_s7 = sshll.u32 %s1900_s6, 4  ;;  %s1671_s7 = int_to_ptr.vmem [resolvable:$true] %s1670_s7 }
 0x553   :  { %s1834_s17 = scalar_lea.vmem %s1671_s7, 384  ;;  %p1839_p9 = scmp.lt.s32.totalorder %s1671_s7, %s1671_s7 }
 0x554   :  { %1695 = vmatpush1.msk.msra.mxu1 %vm47_vm7, %v1259_v57  ;;  %p1835_p8 = scmp.ne.s32.totalorder %s1671_s7, %s1834_s17  ;;  %p1840_p10 = scmp.lt.s32.totalorder %s1834_s17, %s1834_s17 }
 0x555   :  { %1696 = vmatmul.mubr.msk.f32.vlgmr.msra.gmra.mrb[4].mxu1 %vm754_vm1, %v1139_v56 }
 0x556   :  { %p1841_p11 = por %p1840_p10, %p1839_p9 }
 0x558   :  { %p1842_p12 = pnand %p1841_p11, %p1835_p8 }
 0x61e   :  { %v1392_v8 = vpop.f32.mrb[2].mxu1 }
 0x61f   :  { %v1539_v11 = vmul.f32 %v1392_v8, %v2541_v30  ;;  %v1394_v52 = vpop.f32.mrb[3].mxu1 }
 0x620   :  { %v1540_v17 = vmul.f32 %v1394_v52, %v2543_v24 }
 0x621   :  { %v1545_v59 = vsel %vm47_vm7, %v1539_v11, 0.0 }
 0x622   :  { %v1546_v15 = vsel %vm47_vm7, %v1540_v17, 0.0  ;;  %v1463_v22 = vpop.f32.mrb[4].mxu0 }
 0x623   :  { %v1547_v19 = vadd.f32 %v1546_v15, %v1545_v59  ;;  %v1541_v6 = vmul.f32 %v1463_v22, %v2545_v2  ;;  %v1465_v26 = vpop.f32.mrb[5].mxu0  ;;  %v1811_v59 = vld [vmem:[#allocation2 + $0x10] sm:$0xff] }
 0x624   :  { %v1542_v41 = vmul.f32 %v1465_v26, %v2547_v10  ;;  %v1618_v15 = vcombine.high %v1811_v59, %v1811_v59 }
 0x625   :  { %v1548_v29 = vsel %vm47_vm7, %v1541_v6, 0.0 }
 0x626   :  { %v1549_v38 = vadd.f32 %v1548_v29, %v1547_v19  ;;  %v1550_v40 = vsel %vm47_vm7, %v1542_v41, 0.0 }
 0x628   :  { %v1551_v18 = vadd.f32 %v1550_v40, %v1549_v38  ;;  %v1534_v35 = vpop.f32.mrb[4].mxu1 }
 0x629   :  { %v1543_v9 = vmul.f32 %v1534_v35, %v2557_v61  ;;  %v1536_v1 = vpop.f32.mrb[5].mxu1 }
 0x62a   :  { %v1544_v43 = vmul.f32 %v1536_v1, %v2559_v62 }
 0x62b   :  { %v1552_v0 = vsel %vm47_vm7, %v1543_v9, 0.0 }
 0x62c   :  { %v1553_v45 = vadd.f32 %v1552_v0, %v1551_v18  ;;  %v1554_v46 = vsel %vm2792_vm2, %v1544_v43, 0.0 }
 0x62e   :  { %v1555_v39 = vadd.f32 %v1554_v46, %v1553_v45 }
 0x630   :  { %1556 = vadd.xlane.f32.xlu0 %v1555_v39 }
 0x6bd   :  { %v1557_v23 = vpop.xlane.xlu0 %1556 }
 0x6be   :  { %v1558_v4 = vmul.f32 0.001953125, %v1557_v23 }
 0x6c0   :  { %v1559_v21 = vsub.f32 %v1392_v8, %v1558_v4  ;;  %v1560_v12 = vsub.f32 %v1394_v52, %v1558_v4  ;;  %v1561_v33 = vsub.f32 %v1463_v22, %v1558_v4  ;;  %v1562_v36 = vsub.f32 %v1465_v26, %v1558_v4  ;;  %v1810_v52 = vld [vmem:[#allocation2] sm:$0xff] }
 0x6c1   :  { %v1563_v47 = vsub.f32 %v1534_v35, %v1558_v4  ;;  %v1564_v14 = vsub.f32 %v1536_v1, %v1558_v4  ;;  %v1616_v17 = vcombine.high %v1810_v52, %v1810_v52 }
 0x6c2   :  { %v1565_v54 = vmul.f32 %v1559_v21, %v2541_v30  ;;  %v1566_v3 = vmul.f32 %v1560_v12, %v2543_v24  ;;  %v1567_v60 = vmul.f32 %v1561_v33, %v2545_v2  ;;  %v1568_v58 = vmul.f32 %v1562_v36, %v2547_v10 }
 0x6c3   :  { %v1569_v50 = vmul.f32 %v1563_v47, %v2557_v61  ;;  %v1570_v13 = vmul.f32 %v1564_v14, %v2559_v62 }
 0x6c4   :  { %v1571_v63 = vmul.f32 %v1565_v54, %v1565_v54  ;;  %v1572_v16 = vmul.f32 %v1566_v3, %v1566_v3  ;;  %v1573_v34 = vmul.f32 %v1567_v60, %v1567_v60  ;;  %v1574_v27 = vmul.f32 %v1568_v58, %v1568_v58 }
 0x6c5   :  { %v1575_v30 = vmul.f32 %v1569_v50, %v1569_v50  ;;  %v1576_v2 = vmul.f32 %v1570_v13, %v1570_v13 }
 0x6c6   :  { %v1577_v42 = vsel %vm47_vm7, %v1571_v63, 0.0  ;;  %v1578_v56 = vsel %vm47_vm7, %v1572_v16, 0.0  ;;  %v1580_v24 = vsel %vm47_vm7, %v1573_v34, 0.0  ;;  %v1582_v10 = vsel %vm47_vm7, %v1574_v27, 0.0 }
 0x6c7   :  { %v1579_v53 = vadd.f32 %v1578_v56, %v1577_v42  ;;  %v1584_v61 = vsel %vm47_vm7, %v1575_v30, 0.0  ;;  %v1586_v7 = vsel %vm2793_vm6, %v1576_v2, 0.0 }
 0x6c9   :  { %v1581_v5 = vadd.f32 %v1580_v24, %v1579_v53 }
 0x6cb   :  { %v1583_v49 = vadd.f32 %v1582_v10, %v1581_v5 }
 0x6cd   :  { %v1585_v28 = vadd.f32 %v1584_v61, %v1583_v49 }
 0x6cf   :  { %v1587_v62 = vadd.f32 %v1586_v7, %v1585_v28 }
 0x6d1   :  { %1588 = vadd.xlane.f32.xlu1 %v1587_v62 }
 0x6e2   :  { %1607 = vperm.xlu1 %1787, %v1141_v48  }
 0x6e6   :  { %1621 = vrot.lane.b32.xlu1 %v1617_v51, %s1896_s30 }
 0x75e   :  { %v1589_v31 = vpop.xlane.xlu1 %1588 }
 0x75f   :  { %v1590_v57 = vmul.f32 0.001953125, %v1589_v31 }
 0x761   :  { %v1591_v55 = vadd.f32 1e-05, %v1590_v57 }
 0x762   :  { %v1608_v22 = vpop.permute.xlu1 %1607 }
 0x763   :  { %1806 = vrsqrt.f32 %v1591_v55 }
 0x766   :  { %v1622_v6 = vpop.permute.xlu1 %1621 }
 0x767   :  { %v1627_v43 = vsel %vm638_vm13, %v2442_v44, %v1622_v6  ;;  %v1628_v0 = vsel %vm638_vm13, %v1622_v6, %v2474_v20 }
 0x76d   :  { %v1807_v8 = vpop.eup %1806 }
 0x76e   :  { %v1593_v11 = vmul.f32 %v1807_v8, %v1140_v37 }
 0x770   :  { %1596 = vperm.xlu0 %1786, %v1593_v11  }
 0x774   :  { %1619 = vrot.lane.b32.xlu0 %v1616_v17, %s1896_s30 }
 0x778   :  { %1623 = vrot.lane.b32.xlu0 %v1618_v15, %s1896_s30 }
 0x7ef   :  { %v1597_v19 = vpop.permute.xlu0 %1596 }
 0x7f0   :  { %v1601_v26 = vmul.f32 %v1597_v19, %v1567_v60  ;;  %v1602_v41 = vmul.f32 %v1597_v19, %v1568_v58  ;;  %v1599_v29 = vmul.f32 %v1597_v19, %v1565_v54  ;;  %v1600_v38 = vmul.f32 %v1597_v19, %v1566_v3 }
 0x7f1   :  { %v1604_v40 = vmul.f32 %v1597_v19, %v1570_v13  ;;  %v1603_v46 = vmul.f32 %v1597_v19, %v1569_v50 }
 0x7f2   :  { %v1610_v18 = vadd.f32 %v1608_v22, %v1599_v29  ;;  %v1611_v35 = vadd.f32 %v1608_v22, %v1600_v38  ;;  %v1612_v9 = vadd.f32 %v1608_v22, %v1601_v26  ;;  %v1613_v1 = vadd.f32 %v1608_v22, %v1602_v41 }
 0x7f3   :  { %v1620_v45 = vpop.permute.xlu0 %1619  ;;  %v1615_v36 = vadd.f32 %v1608_v22, %v1604_v40  ;;  %v1614_v58 = vadd.f32 %v1608_v22, %v1603_v46 }
 0x7f4   :  { %v1625_v39 = vsel %vm638_vm13, %v2450_v32, %v1620_v45  ;;  %v1626_v23 = vsel %vm638_vm13, %v1620_v45, %v2442_v44  ;;  %v1638_v4 = vadd.f32 %v1627_v43, %v1612_v9  ;;  %v1639_v21 = vadd.f32 %v1628_v0, %v1613_v1 }
 0x7f5   :  { %v1636_v12 = vadd.f32 %v1625_v39, %v1610_v18  ;;  %v1637_v33 = vadd.f32 %v1626_v23, %v1611_v35 }
 0x7f6   :  { %v1644_v47 = vmax.f32 %v1638_v4, 0.0  ;;  %v1645_v14 = vmax.f32 %v1639_v21, 0.0 }
 0x7f7   :  { %v1642_v54 = vmax.f32 %v1636_v12, 0.0  ;;  %v1643_v3 = vmax.f32 %v1637_v33, 0.0  ;;  %v1624_v60 = vpop.permute.xlu0 %1623 }
 0x7f8   :  { %v1629_v50 = vsel %vm638_vm13, %v2474_v20, %v1624_v60  ;;  %v1641_v63 = vadd.f32 %v1624_v60, %v1615_v36  ;;  %v1655_v16 = vcombine.low %v1644_v47, %v1645_v14 }
 0x7f9   :  { %v1654_v32 = vcombine.low %v1642_v54, %v1643_v3  ;;  %v1640_v34 = vadd.f32 %v1629_v50, %v1614_v58 }
 0x7fa   :  { %v1647_v13 = vmax.f32 %v1641_v63, 0.0  ;;  %1661 = vst [vmem:[#allocation7 + $0x8] sm:$0xff] %v1655_v16 }
 0x7fb   :  { %1660 = vst [vmem:[#allocation7] sm:$0xff] %v1654_v32  ;;  %v1646_v44 = vmax.f32 %v1640_v34, 0.0 }
 0x7fd   :  { %v1656_v27 = vcombine.low %v1646_v44, %v1647_v13 }
 0x7ff   :  { %1663 = vst.msk [vmem:[#allocation7 + $0x10] sm:$0xff] %vm1662_vm11, %v1656_v27 }
 0x800   :  { %1845 = shalt.err (!%p1842_p12)
}
 0x801   :  { %s1846_s20 = scalar_lea.hbm %s2789_s8, 384 }
 0x802   :  { %p1847_p13 = scmp.ne.s32.totalorder %s2789_s8, %s1846_s20  ;;  %p1850_p0 = scmp.lt.u32.totalorder %s1846_s20, %s2789_s8 }
 0x804   :  { %p1852_p1 = pnand %p1850_p0, %p1847_p13 }
 0x806   :  { %1855 = shalt.err (!%p1852_p1)
}
 0x807   :  { %1673 = dma.vmem_to_hbm [thread:$0]  %s1671_s7, 384, %s2789_s8, [#allocation6]  }
 0x808   :  { %1858 = dma.done.wait [#allocation6], 384  }
 0x809   :  { %1859 = vsyncadd [#allocation6], 4294966912 }
 0x80a   :  { %1677 = vsyncpa [#allocation5], 1 }
 0x80b   :  { %1678 = vsyncpa [#allocation6], 1 }

</bundles_post_ra>
